<compile_context>
chip_gen: v5e
topology: v5e:2x2
jax: 0.10.0
libtpu: 0.0.40
codegen_flags: <defaults>
</compile_context>

<pallas_src>
import jax
import jax.numpy as jnp
from jax.experimental import pallas as pl
from jax.experimental.pallas import tpu as pltpu

NODES_PER_GRAPH = 128   # fixed by lin1 = Linear(128 * hid_channels, 1)
GRAPHS_PER_TILE = 8     # TG: graphs per grid step -> 1024-node x tile (~512 KiB bf16)
LANE = 128


def _round_up(v, m):
    return (v + m - 1) // m * m


def cheb_kernel(x_ref, w0_ref, b0_ref, w1t_ref, sel_ref, b1_ref, o_ref):
    # --- ChebConv (K=1) + ReLU: h = relu(x @ W0 + b0) -----------------------
    # bf16 operands, f32 accumulation on the MXU.
    h = jnp.dot(x_ref[...], w0_ref[...], preferred_element_type=jnp.float32)
    h = jnp.maximum(h + b0_ref[...], 0.0)                    # [TG*128, H] f32

    # --- linearize + lin1 (MXU-friendly) -------------------------------------
    # per-graph <flatten(h_g), w1_flat>  ==  sum_c ( sel @ (h * w1_tiled) )[g, c]
    p = h * w1t_ref[...]                                      # VPU elementwise   [TG*128, H]
    s = jnp.dot(sel_ref[...], p,
                preferred_element_type=jnp.float32)           # MXU node-reduce   [TG, H]
    r = jnp.sum(s, axis=1, keepdims=True)                     # tiny lane-reduce  [TG, 1]

    # --- sigmoid --------------------------------------------------------------
    o_ref[...] = jax.nn.sigmoid(r + b1_ref[...])              # b1: (1, 1) broadcast


def cheb_forward(x, w0_t, b0, w1_r, b1, *, graphs_per_tile=GRAPHS_PER_TILE):
    """x: [N, C] node features (128 contiguous nodes per graph). Returns [G, 1]."""
    N, C = x.shape
    H = w0_t.shape[1]
    # linearize() contract: exactly 128 nodes per graph, contiguous, batch order.
    assert N % NODES_PER_GRAPH == 0, "expected 128 contiguous nodes per graph"
    G = N // NODES_PER_GRAPH

    TG = graphs_per_tile
    Gp = _round_up(G, TG)                      # pad graph axis so every tile is full
    Cp = _round_up(C, LANE)                    # pad contraction dim 151 -> 256
    R = TG * NODES_PER_GRAPH                   # nodes per grid step

    # bf16 inputs for the ChebConv matmul; zero-pad nodes (fake graphs) and K dim.
    x_p = jnp.zeros((Gp * NODES_PER_GRAPH, Cp), jnp.bfloat16)
    x_p = x_p.at[:N, :C].set(x.astype(jnp.bfloat16))
    w0_p = jnp.zeros((Cp, H), jnp.bfloat16).at[:C, :].set(w0_t.astype(jnp.bfloat16))

    b0_f = b0.astype(jnp.float32).reshape(1, H)
    b1_f = b1.astype(jnp.float32).reshape(1, 1)

    # lin1 weight tiled over the TG graphs of one tile (stays VMEM-resident).
    w1_tiled = jnp.tile(w1_r.astype(jnp.float32), (TG, 1))                    # [R, H]
    # Block-ones per-graph node-reduction operator (drives the MXU, frees the XLU).
    sel = jnp.kron(jnp.eye(TG, dtype=jnp.float32),
                   jnp.ones((1, NODES_PER_GRAPH), jnp.float32))               # [TG, R]

    out = pl.pallas_call(
        cheb_kernel,
        out_shape=jax.ShapeDtypeStruct((Gp, 1), jnp.float32),
        grid=(Gp // TG,),
        in_specs=[
            pl.BlockSpec((R, Cp), lambda g: (g, 0)),     # x: streamed / double-buffered
            pl.BlockSpec((Cp, H), lambda g: (0, 0)),     # W0: resident
            pl.BlockSpec((1, H), lambda g: (0, 0)),      # b0: resident
            pl.BlockSpec((R, H), lambda g: (0, 0)),      # w1 tiled: resident (~256 KiB)
            pl.BlockSpec((TG, R), lambda g: (0, 0)),     # sel: resident (~32 KiB)
            pl.BlockSpec((1, 1), lambda g: (0, 0)),      # b1: resident
        ],
        out_specs=pl.BlockSpec((TG, 1), lambda g: (g, 0)),
        compiler_params=pltpu.CompilerParams(
            dimension_semantics=("parallel",),           # megacore / 2-TC sharding
        ),
    )(x_p, w0_p, b0_f, w1_tiled, sel, b1_f)
    return out[:G]


def cheb_reference(x, w0_t, b0, w1_r, b1):
    h = jnp.maximum(x @ w0_t + b0.reshape(1, -1), 0.0)
    G = x.shape[0] // NODES_PER_GRAPH
    hf = h.reshape(G, NODES_PER_GRAPH * w0_t.shape[1])
    return jax.nn.sigmoid(hf @ w1_r.reshape(-1, 1) + b1.reshape(1, 1))


if __name__ == "__main__":
    # Module defaults: in_channels=151, hid_channels=64, K=1; 2 graphs x 128 nodes.
    in_channels, hid_channels = 151, 64
    num_graphs = 2
    n_nodes = num_graphs * NODES_PER_GRAPH  # 256

    key = jax.random.PRNGKey(0)
    kx, kw0, kb0, kw1, kb1 = jax.random.split(key, 5)

    x = jax.random.normal(kx, (n_nodes, in_channels), dtype=jnp.float32)
    # ChebConv lins[0]: Linear(in_channels, hid, bias=False) + shared bias.
    w0_t = jax.random.normal(kw0, (in_channels, hid_channels), dtype=jnp.float32) * 0.05
    b0 = jax.random.normal(kb0, (1, hid_channels), dtype=jnp.float32) * 0.05
    # lin1: Linear(128*hid, 1) -> weight reshaped to [128, hid] (node, channel) order.
    w1_r = jax.random.normal(kw1, (NODES_PER_GRAPH, hid_channels), dtype=jnp.float32) * 0.01
    b1 = jax.random.normal(kb1, (1, 1), dtype=jnp.float32) * 0.01

    # edge_index / edge_weight deliberately absent: with K=1 the ChebConv output is
    # independent of graph connectivity.
    out = cheb_forward(x, w0_t, b0, w1_r, b1)
    out = jax.block_until_ready(out)

    ref = cheb_reference(x, w0_t, b0, w1_r, b1)
    assert out.shape == (num_graphs, 1)
    # bf16 matmul inputs (f32 accumulation) -> allow a few e-3 of slack vs f32 ref.
    assert jnp.allclose(out, ref, atol=5e-3, rtol=5e-3), (out, ref)

    print("KERNEL_OK")
</pallas_src>

<mosaic_0001>
module attributes {stable_mosaic.version = 11 : i64} {
  func.func @cheb_kernel(%arg0: i32, %arg1: memref<1024x256xbf16, #tpu.memory_space<vmem>>, %arg2: memref<256x64xbf16, #tpu.memory_space<vmem>>, %arg3: memref<1x64xf32, #tpu.memory_space<vmem>>, %arg4: memref<1024x64xf32, #tpu.memory_space<vmem>>, %arg5: memref<8x1024xf32, #tpu.memory_space<vmem>>, %arg6: memref<1x1xf32, #tpu.memory_space<vmem>>, %arg7: memref<8x1xf32, #tpu.memory_space<vmem>>) attributes {dimension_semantics = [#tpu.dimension_semantics<parallel>], iteration_bounds = array<i64: 1>, scalar_prefetch = 0 : i64, scratch_operands = 0 : i64, tpu.core_type = #tpu.core_type<tc>, window_params = [{transform_indices = @transform_0, window_bounds = array<i64: 1024, 256>}, {pipeline_mode = #tpu.pipeline_mode<synchronous>, transform_indices = @transform_1, window_bounds = array<i64: 256, 64>}, {pipeline_mode = #tpu.pipeline_mode<synchronous>, transform_indices = @transform_2, window_bounds = array<i64: 1, 64>}, {pipeline_mode = #tpu.pipeline_mode<synchronous>, transform_indices = @transform_3, window_bounds = array<i64: 1024, 64>}, {pipeline_mode = #tpu.pipeline_mode<synchronous>, transform_indices = @transform_4, window_bounds = array<i64: 8, 1024>}, {pipeline_mode = #tpu.pipeline_mode<synchronous>, transform_indices = @transform_5, window_bounds = array<i64: 1, 1>}, {transform_indices = @transform_6, window_bounds = array<i64: 8, 1>}]} {
    %c0 = arith.constant 0 : index
    %c0_0 = arith.constant 0 : index
    %0 = vector.load %arg1[%c0, %c0_0] : memref<1024x256xbf16, #tpu.memory_space<vmem>>, vector<1024x256xbf16>
    %c0_1 = arith.constant 0 : index
    %c0_2 = arith.constant 0 : index
    %1 = vector.load %arg2[%c0_1, %c0_2] : memref<256x64xbf16, #tpu.memory_space<vmem>>, vector<256x64xbf16>
    %cst = arith.constant dense<0.000000e+00> : vector<1024x64xf32>
    %2 = tpu.matmul %0, %1, %cst {dimension_numbers = #tpu.dot_dimension_numbers<[1], [0], [0], [1], [0, 0, 1, 1], [], []>} : vector<1024x256xbf16>, vector<256x64xbf16>, vector<1024x64xf32> -> vector<1024x64xf32>
    %c0_3 = arith.constant 0 : index
    %c0_4 = arith.constant 0 : index
    %3 = vector.load %arg3[%c0_3, %c0_4] : memref<1x64xf32, #tpu.memory_space<vmem>>, vector<1x64xf32>
    %4 = vector.broadcast %3 : vector<1x64xf32> to vector<1024x64xf32>
    %5 = arith.addf %2, %4 : vector<1024x64xf32>
    %cst_5 = arith.constant 0.000000e+00 : f32
    %6 = vector.broadcast %cst_5 : f32 to vector<1024x64xf32>
    %7 = arith.maximumf %5, %6 : vector<1024x64xf32>
    %c0_6 = arith.constant 0 : index
    %c0_7 = arith.constant 0 : index
    %8 = vector.load %arg4[%c0_6, %c0_7] : memref<1024x64xf32, #tpu.memory_space<vmem>>, vector<1024x64xf32>
    %9 = arith.mulf %7, %8 : vector<1024x64xf32>
    %c0_8 = arith.constant 0 : index
    %c0_9 = arith.constant 0 : index
    %10 = vector.load %arg5[%c0_8, %c0_9] : memref<8x1024xf32, #tpu.memory_space<vmem>>, vector<8x1024xf32>
    %cst_10 = arith.constant dense<0.000000e+00> : vector<8x64xf32>
    %11 = tpu.matmul %10, %9, %cst_10 {dimension_numbers = #tpu.dot_dimension_numbers<[1], [0], [0], [1], [0, 0, 1, 1], [], []>} : vector<8x1024xf32>, vector<1024x64xf32>, vector<8x64xf32> -> vector<8x64xf32>
    %cst_11 = arith.constant dense<0.000000e+00> : vector<8xf32>
    %12 = vector.multi_reduction <add>, %11, %cst_11 [1] : vector<8x64xf32> to vector<8xf32>
    %13 = vector.shape_cast %12 : vector<8xf32> to vector<8x1xf32>
    %c0_12 = arith.constant 0 : index
    %c0_13 = arith.constant 0 : index
    %14 = vector.load %arg6[%c0_12, %c0_13] : memref<1x1xf32, #tpu.memory_space<vmem>>, vector<1x1xf32>
    %15 = vector.broadcast %14 : vector<1x1xf32> to vector<8x1xf32>
    %16 = arith.addf %13, %15 : vector<8x1xf32>
    %17 = arith.negf %16 : vector<8x1xf32>
    %18 = math.exp %17 : vector<8x1xf32>
    %cst_14 = arith.constant 1.000000e+00 : f32
    %19 = vector.broadcast %cst_14 : f32 to vector<8x1xf32>
    %20 = arith.addf %19, %18 : vector<8x1xf32>
    %21 = arith.divf %19, %20 : vector<8x1xf32>
    %c0_15 = arith.constant 0 : index
    %c0_16 = arith.constant 0 : index
    %22 = vector.load %arg7[%c0_15, %c0_16] : memref<8x1xf32, #tpu.memory_space<vmem>>, vector<8x1xf32>
    tpu.vector_store %arg7[%c0_15, %c0_16], %21 {strides = array<i32>} : memref<8x1xf32, #tpu.memory_space<vmem>>, vector<8x1xf32>,
    return
  }
  func.func @transform_0(%arg0: i32) -> (i32, i32) {
    %c0_i32 = arith.constant 0 : i32
    %c0_i32_0 = arith.constant 0 : i32
    return %arg0, %c0_i32 : i32, i32
  }
  func.func @transform_1(%arg0: i32) -> (i32, i32) {
    %c0_i32 = arith.constant 0 : i32
    %c0_i32_0 = arith.constant 0 : i32
    %c0_i32_1 = arith.constant 0 : i32
    return %c0_i32, %c0_i32_0 : i32, i32
  }
  func.func @transform_2(%arg0: i32) -> (i32, i32) {
    %c0_i32 = arith.constant 0 : i32
    %c0_i32_0 = arith.constant 0 : i32
    %c0_i32_1 = arith.constant 0 : i32
    return %c0_i32, %c0_i32_0 : i32, i32
  }
  func.func @transform_3(%arg0: i32) -> (i32, i32) {
    %c0_i32 = arith.constant 0 : i32
    %c0_i32_0 = arith.constant 0 : i32
    %c0_i32_1 = arith.constant 0 : i32
    return %c0_i32, %c0_i32_0 : i32, i32
  }
  func.func @transform_4(%arg0: i32) -> (i32, i32) {
    %c0_i32 = arith.constant 0 : i32
    %c0_i32_0 = arith.constant 0 : i32
    %c0_i32_1 = arith.constant 0 : i32
    return %c0_i32, %c0_i32_0 : i32, i32
  }
  func.func @transform_5(%arg0: i32) -> (i32, i32) {
    %c0_i32 = arith.constant 0 : i32
    %c0_i32_0 = arith.constant 0 : i32
    %c0_i32_1 = arith.constant 0 : i32
    return %c0_i32, %c0_i32_0 : i32, i32
  }
  func.func @transform_6(%arg0: i32) -> (i32, i32) {
    %c0_i32 = arith.constant 0 : i32
    %c0_i32_0 = arith.constant 0 : i32
    return %arg0, %c0_i32 : i32, i32
  }
}

</mosaic_0001>

<bundles_post_ra>
// kernel: tpu_custom_call.1
= control target key start
LH: loop header
LB: loop body
LE: loop exit
PB: predicated region body
PF: predicated region fallthrough
CT: control target
= control target key end

     0   :  { %vm2135_vm0 = vcmask 523264   ;;  %vm2163_vm4 = vcmask 7168   ;;  %s4694_s1 = inlined_call_operand.vmem [shape: bf16[256,64], index: 1, kind: input, shape index: {}]   ;;  %s4695_s2 = inlined_call_operand.vmem [shape: f32[1,64], index: 2, kind: input, shape index: {}]   ;;  %s4696_s0 = inlined_call_operand.vmem [shape: bf16[1024,256], index: 0, kind: input, shape index: {}]   ;;  %s4697_s3 = inlined_call_operand.vmem [shape: f32[1024,64], index: 3, kind: input, shape index: {}]   ;;  %s4698_s4 = inlined_call_operand.vmem [shape: f32[8,1024], index: 4, kind: input, shape index: {}]   ;;  %s4699_s5 = inlined_call_operand.<no memory space> [shape: f32[1,1], index: 5, kind: input, shape index: {}]   ;;  %s4700_s6 = inlined_call_operand.vmem [shape: f32[8,1], index: 6, kind: output, shape index: {}]  }
   0x1   :  { %v2881_v0 = vld [vmem:[%s4694_s1 + $0x38] sm:$0xff]  ;;  %v2880_v2 = vld [vmem:[%s4694_s1 + $0x30] sm:$0xff]  ;;  %v2879_v4 = vld [vmem:[%s4694_s1 + $0x28] sm:$0xff] }
   0x2   :  { %v2889_v1 = vld [vmem:[%s4694_s1 + $0x78] sm:$0xff]  ;;  %925 = vmatpush.bf16.msra.mxu0 %v2881_v0  ;;  %v2888_v3 = vld [vmem:[%s4694_s1 + $0x70] sm:$0xff]  ;;  %2890 = vmatpush.bf16.msra.mxu2 %v2881_v0  ;;  %v2887_v5 = vld [vmem:[%s4694_s1 + $0x68] sm:$0xff] }
   0x3   :  { %1254 = vmatpush.bf16.msra.mxu1 %v2889_v1  ;;  %2898 = vmatpush.bf16.msra.mxu3 %v2889_v1  ;;  %v2878_v6 = vld [vmem:[%s4694_s1 + $0x20] sm:$0xff]  ;;  %v2877_v8 = vld [vmem:[%s4694_s1 + $0x18] sm:$0xff]  ;;  %v2876_v10 = vld [vmem:[%s4694_s1 + $0x10] sm:$0xff] }
   0x4   :  { %v2886_v7 = vld [vmem:[%s4694_s1 + $0x60] sm:$0xff]  ;;  %v2885_v9 = vld [vmem:[%s4694_s1 + $0x58] sm:$0xff]  ;;  %v2884_v11 = vld [vmem:[%s4694_s1 + $0x50] sm:$0xff] }
   0x5   :  { %v2875_v12 = vld [vmem:[%s4694_s1 + $0x8] sm:$0xff]  ;;  %v2874_v14 = vld [vmem:[%s4694_s1] sm:$0xff]  ;;  %v2179_v22 = vld [vmem:[%s4696_s0 + $0x10] sm:$0xf] }
   0x6   :  { %926 = vmatpush.bf16.msra.mxu0 %v2880_v2  ;;  %2891 = vmatpush.bf16.msra.mxu2 %v2880_v2  ;;  %v2883_v13 = vld [vmem:[%s4694_s1 + $0x48] sm:$0xff]  ;;  %v2882_v15 = vld [vmem:[%s4694_s1 + $0x40] sm:$0xff]  ;;  %v2749_v23 = vld [vmem:[%s4696_s0 + $0x14] sm:$0xf0] }
   0x7   :  { %1255 = vmatpush.bf16.msra.mxu1 %v2888_v3  ;;  %2899 = vmatpush.bf16.msra.mxu3 %v2888_v3  ;;  %v2171_v16 = vld [vmem:[%s4696_s0] sm:$0xf]  ;;  %v2747_v17 = vld [vmem:[%s4696_s0 + $0x4] sm:$0xf0]  ;;  %v2746_v18 = vld [vmem:[%s4696_s0 + $0x4] sm:$0xf]  ;;  %v2180_v26 = vor.u32 %v2749_v23, %v2179_v22 }
   0x8   :  { %v2173_v19 = vld [vmem:[%s4696_s0 + $0x8] sm:$0xf0]  ;;  %v2172_v20 = vor.u32 %v2747_v17, %v2171_v16  ;;  %v2748_v24 = vld [vmem:[%s4696_s0 + $0x14] sm:$0xf]  ;;  %v2181_v25 = vld [vmem:[%s4696_s0 + $0x18] sm:$0xf0] }
   0x9   :  { %v2176_v21 = vor.u32 %v2746_v18, %v2173_v19  ;;  %v2184_v27 = vor.u32 %v2748_v24, %v2181_v25  ;;  %v2187_v28 = vld [vmem:[%s4696_s0 + $0x20] sm:$0xf]  ;;  %v2751_v29 = vld [vmem:[%s4696_s0 + $0x24] sm:$0xf0]  ;;  %v2750_v30 = vld [vmem:[%s4696_s0 + $0x24] sm:$0xf] }
   0xa   :  { %927 = vmatpush.bf16.msra.mxu0 %v2879_v4  ;;  %2892 = vmatpush.bf16.msra.mxu2 %v2879_v4  ;;  %v2189_v31 = vld [vmem:[%s4696_s0 + $0x28] sm:$0xf0]  ;;  %v2188_v32 = vor.u32 %v2751_v29, %v2187_v28  ;;  %v2195_v34 = vld [vmem:[%s4696_s0 + $0x30] sm:$0xf]  ;;  %v2753_v35 = vld [vmem:[%s4696_s0 + $0x34] sm:$0xf0] }
   0xb   :  { %1256 = vmatpush.bf16.msra.mxu1 %v2887_v5  ;;  %2900 = vmatpush.bf16.msra.mxu3 %v2887_v5  ;;  %v2192_v33 = vor.u32 %v2750_v30, %v2189_v31  ;;  %v2752_v36 = vld [vmem:[%s4696_s0 + $0x34] sm:$0xf]  ;;  %v2197_v37 = vld [vmem:[%s4696_s0 + $0x38] sm:$0xf0]  ;;  %v2196_v38 = vor.u32 %v2753_v35, %v2195_v34  ;;  %v2459_v40 = vld [vmem:[%s4696_s0 + $0x240] sm:$0xf] }
   0xc   :  { %v2200_v39 = vor.u32 %v2752_v36, %v2197_v37  ;;  %v2819_v41 = vld [vmem:[%s4696_s0 + $0x244] sm:$0xf0]  ;;  %v2203_v43 = vld [vmem:[%s4696_s0 + $0x40] sm:$0xf]  ;;  %v2754_v45 = vld [vmem:[%s4696_s0 + $0x44] sm:$0xf] }
   0xd   :  { %v2460_v42 = vor.u32 %v2819_v41, %v2459_v40  ;;  %v2755_v44 = vld [vmem:[%s4696_s0 + $0x44] sm:$0xf0]  ;;  %v2205_v46 = vld [vmem:[%s4696_s0 + $0x48] sm:$0xf0]  ;;  %v2467_v49 = vld [vmem:[%s4696_s0 + $0x250] sm:$0xf] }
   0xe   :  { %928 = vmatpush.bf16.msra.mxu0 %v2878_v6  ;;  %2893 = vmatpush.bf16.msra.mxu2 %v2878_v6  ;;  %v2204_v47 = vor.u32 %v2755_v44, %v2203_v43  ;;  %v2208_v48 = vor.u32 %v2754_v45, %v2205_v46  ;;  %v2821_v50 = vld [vmem:[%s4696_s0 + $0x254] sm:$0xf0]  ;;  %v2211_v52 = vld [vmem:[%s4696_s0 + $0x50] sm:$0xf]  ;;  %v2756_v54 = vld [vmem:[%s4696_s0 + $0x54] sm:$0xf] }
   0xf   :  { %1257 = vmatpush.bf16.msra.mxu1 %v2886_v7  ;;  %2901 = vmatpush.bf16.msra.mxu3 %v2886_v7  ;;  %v2468_v51 = vor.u32 %v2821_v50, %v2467_v49  ;;  %v2757_v53 = vld [vmem:[%s4696_s0 + $0x54] sm:$0xf0]  ;;  %v2213_v55 = vld [vmem:[%s4696_s0 + $0x58] sm:$0xf0]  ;;  %v2818_v58 = vld [vmem:[%s4696_s0 + $0x244] sm:$0xf] }
  0x10   :  { %v2212_v56 = vor.u32 %v2757_v53, %v2211_v52  ;;  %v2216_v57 = vor.u32 %v2756_v54, %v2213_v55  ;;  %v2461_v59 = vld [vmem:[%s4696_s0 + $0x248] sm:$0xf0]  ;;  %v2219_v61 = vld [vmem:[%s4696_s0 + $0x60] sm:$0xf]  ;;  %v2759_v62 = vld [vmem:[%s4696_s0 + $0x64] sm:$0xf0] }
  0x11   :  { %v2464_v60 = vor.u32 %v2818_v58, %v2461_v59  ;;  %v2758_v63 = vld [vmem:[%s4696_s0 + $0x64] sm:$0xf]  ;;  %v2221_v0 = vld [vmem:[%s4696_s0 + $0x68] sm:$0xf0]  ;;  %v2475_v1 = vld [vmem:[%s4696_s0 + $0x260] sm:$0xf]  ;;  %v2220_v4 = vor.u32 %v2759_v62, %v2219_v61 }
  0x12   :  { %929 = vmatpush.bf16.msra.mxu0 %v2877_v8  ;;  %2894 = vmatpush.bf16.msra.mxu2 %v2877_v8  ;;  %v2823_v2 = vld [vmem:[%s4696_s0 + $0x264] sm:$0xf0]  ;;  %v2224_v5 = vor.u32 %v2758_v63, %v2221_v0  ;;  %v2820_v6 = vld [vmem:[%s4696_s0 + $0x254] sm:$0xf]  ;;  %v2469_v7 = vld [vmem:[%s4696_s0 + $0x258] sm:$0xf0] }
  0x13   :  { %1258 = vmatpush.bf16.msra.mxu1 %v2885_v9  ;;  %2902 = vmatpush.bf16.msra.mxu3 %v2885_v9  ;;  %v2476_v3 = vor.u32 %v2823_v2, %v2475_v1  ;;  %v2227_v8 = vld [vmem:[%s4696_s0 + $0x70] sm:$0xf]  ;;  %v2472_v9 = vor.u32 %v2820_v6, %v2469_v7  ;;  %v2822_v18 = vld [vmem:[%s4696_s0 + $0x264] sm:$0xf]  ;;  %v2477_v19 = vld [vmem:[%s4696_s0 + $0x268] sm:$0xf0] }
  0x14   :  { %v2763_v22 = vld [vmem:[%s4696_s0 + $0x84] sm:$0xf0]  ;;  %v2762_v23 = vld [vmem:[%s4696_s0 + $0x84] sm:$0xf]  ;;  %v2237_v24 = vld [vmem:[%s4696_s0 + $0x88] sm:$0xf0] }
  0x15   :  { %v3150_v25 = vld [vmem:[%s4695_s2] ss:$0 sm:$0xff]  ;;  %v2240_v30 = vor.u32 %v2762_v23, %v2237_v24  ;;  %v2243_v41 = vld [vmem:[%s4696_s0 + $0x90] sm:$0xf]  ;;  %v2765_v43 = vld [vmem:[%s4696_s0 + $0x94] sm:$0xf0] }
  0x16   :  { %930 = vmatpush.bf16.msra.mxu0 %v2876_v10  ;;  %2895 = vmatpush.bf16.msra.mxu2 %v2876_v10  ;;  %v2761_v10 = vld [vmem:[%s4696_s0 + $0x74] sm:$0xf0]  ;;  %v2764_v44 = vld [vmem:[%s4696_s0 + $0x94] sm:$0xf]  ;;  %v2245_v45 = vld [vmem:[%s4696_s0 + $0x98] sm:$0xf0]  ;;  %v2244_v49 = vor.u32 %v2765_v43, %v2243_v41 }
  0x17   :  { %1259 = vmatpush.bf16.msra.mxu1 %v2884_v11  ;;  %2903 = vmatpush.bf16.msra.mxu3 %v2884_v11  ;;  %v2760_v11 = vld [vmem:[%s4696_s0 + $0x74] sm:$0xf]  ;;  %v2228_v16 = vor.u32 %v2761_v10, %v2227_v8  ;;  %v2499_v46 = vld [vmem:[%s4696_s0 + $0x290] sm:$0xf]  ;;  %v2248_v50 = vor.u32 %v2764_v44, %v2245_v45  ;;  %v2826_v58 = vld [vmem:[%s4696_s0 + $0x284] sm:$0xf] }
  0x18   :  { %v2493_v59 = vld [vmem:[%s4696_s0 + $0x288] sm:$0xf0]  ;;  %v2251_v61 = vld [vmem:[%s4696_s0 + $0xa0] sm:$0xf]  ;;  %v2767_v63 = vld [vmem:[%s4696_s0 + $0xa4] sm:$0xf0] }
  0x19   :  { %v2496_v62 = vor.u32 %v2826_v58, %v2493_v59  ;;  %v2766_v0 = vld [vmem:[%s4696_s0 + $0xa4] sm:$0xf]  ;;  %v2253_v1 = vld [vmem:[%s4696_s0 + $0xa8] sm:$0xf0]  ;;  %v2507_v2 = vld [vmem:[%s4696_s0 + $0x2a0] sm:$0xf] }
  0x1a   :  { %931 = vmatpush.bf16.msra.mxu0 %v2875_v12  ;;  %2896 = vmatpush.bf16.msra.mxu2 %v2875_v12  ;;  %v2229_v12 = vld [vmem:[%s4696_s0 + $0x78] sm:$0xf0]  ;;  %v2256_v6 = vor.u32 %v2766_v0, %v2253_v1  ;;  %v2833_v23 = vld [vmem:[%s4696_s0 + $0x2b4] sm:$0xf0]  ;;  %v2770_v43 = vld [vmem:[%s4696_s0 + $0xc4] sm:$0xf] }
  0x1b   :  { %1260 = vmatpush.bf16.msra.mxu1 %v2883_v13  ;;  %2904 = vmatpush.bf16.msra.mxu3 %v2883_v13  ;;  %v2483_v13 = vld [vmem:[%s4696_s0 + $0x270] sm:$0xf]  ;;  %v2232_v17 = vor.u32 %v2760_v11, %v2229_v12  ;;  %v2269_v44 = vld [vmem:[%s4696_s0 + $0xc8] sm:$0xf0]  ;;  %v2523_v45 = vld [vmem:[%s4696_s0 + $0x2c0] sm:$0xf] }
  0x1c   :  { %v2517_v58 = vld [vmem:[%s4696_s0 + $0x2b8] sm:$0xf0]  ;;  %v2275_v59 = vld [vmem:[%s4696_s0 + $0xd0] sm:$0xf] }
  0x1d   :  { %v2277_v0 = vld [vmem:[%s4696_s0 + $0xd8] sm:$0xf0]  ;;  %v2531_v1 = vld [vmem:[%s4696_s0 + $0x2d0] sm:$0xf] }
  0x1e   :  { %932 = vmatpush.bf16.msra.mxu0 %v2874_v14  ;;  %2897 = vmatpush.bf16.msra.mxu2 %v2874_v14  ;;  %v2825_v14 = vld [vmem:[%s4696_s0 + $0x274] sm:$0xf0] }
  0x1f   :  { %1261 = vmatpush.bf16.msra.mxu1 %v2882_v15  ;;  %2905 = vmatpush.bf16.msra.mxu3 %v2882_v15  ;;  %v2484_v15 = vor.u32 %v2825_v14, %v2483_v13  ;;  %v2828_v14 = vld [vmem:[%s4696_s0 + $0x294] sm:$0xf] }
  0x21   :  { %933 = vmatmul.bf16.vlgmr.msra.gmra.mxu0 %v2172_v20  ;;  %1113 = vmatmul.bf16.vlgmr.msra.gmra.mxu2 %v2460_v42  ;;  %v2235_v20 = vld [vmem:[%s4696_s0 + $0x80] sm:$0xf] }
  0x22   :  { %1262 = vmatmul.bf16.vlgmr.msra.gmra.mxu1 %v2176_v21  ;;  %1442 = vmatmul.bf16.vlgmr.msra.gmra.mxu3 %v2464_v60  ;;  %v2480_v21 = vor.u32 %v2822_v18, %v2477_v19  ;;  %v2236_v29 = vor.u32 %v2763_v22, %v2235_v20  ;;  %v2769_v19 = vld [vmem:[%s4696_s0 + $0xb4] sm:$0xf0]  ;;  %v2768_v20 = vld [vmem:[%s4696_s0 + $0xb4] sm:$0xf]  ;;  %v2515_v22 = vld [vmem:[%s4696_s0 + $0x2b0] sm:$0xf] }
  0x23   :  { %v2516_v24 = vor.u32 %v2833_v23, %v2515_v22 }
  0x31   :  { %938 = vmatmul.bf16.gmra.mxu0 %v2180_v26  ;;  %1118 = vmatmul.bf16.gmra.mxu2 %v2468_v51  ;;  %v2491_v26 = vld [vmem:[%s4696_s0 + $0x280] sm:$0xf] }
  0x32   :  { %1267 = vmatmul.bf16.gmra.mxu1 %v2184_v27  ;;  %1447 = vmatmul.bf16.gmra.mxu3 %v2472_v9  ;;  %v2827_v27 = vld [vmem:[%s4696_s0 + $0x284] sm:$0xf0] }
  0x33   :  { %v2492_v28 = vor.u32 %v2827_v27, %v2491_v26 }
  0x41   :  { %943 = vmatmul.bf16.gmra.mxu0 %v2188_v32  ;;  %1123 = vmatmul.bf16.gmra.mxu2 %v2476_v3  ;;  %v2831_v3 = vld [vmem:[%s4696_s0 + $0x2a4] sm:$0xf0] }
  0x42   :  { %1272 = vmatmul.bf16.gmra.mxu1 %v2192_v33  ;;  %1452 = vmatmul.bf16.gmra.mxu3 %v2480_v21  ;;  %v2261_v21 = vld [vmem:[%s4696_s0 + $0xb8] sm:$0xf0] }
  0x43   :  { %v2264_v27 = vor.u32 %v2768_v20, %v2261_v21  ;;  %v2539_v20 = vld [vmem:[%s4696_s0 + $0x2e0] sm:$0xf]  ;;  %v2839_v21 = vld [vmem:[%s4696_s0 + $0x2e4] sm:$0xf0] }
  0x44   :  { %v2540_v22 = vor.u32 %v2839_v21, %v2539_v20  ;;  %v2541_v20 = vld [vmem:[%s4696_s0 + $0x2e8] sm:$0xf0] }
  0x51   :  { %948 = vmatmul.bf16.gmra.mxu0 %v2196_v38  ;;  %1128 = vmatmul.bf16.gmra.mxu2 %v2484_v15  ;;  %v2824_v38 = vld [vmem:[%s4696_s0 + $0x274] sm:$0xf]  ;;  %v2501_v15 = vld [vmem:[%s4696_s0 + $0x298] sm:$0xf0] }
  0x52   :  { %1277 = vmatmul.bf16.gmra.mxu1 %v2200_v39  ;;  %v2485_v39 = vld [vmem:[%s4696_s0 + $0x278] sm:$0xf0]  ;;  %v2504_v18 = vor.u32 %v2828_v14, %v2501_v15  ;;  %v2775_v15 = vld [vmem:[%s4696_s0 + $0xe4] sm:$0xf0] }
  0x53   :  { %v2488_v42 = vor.u32 %v2824_v38, %v2485_v39  ;;  %v2267_v39 = vld [vmem:[%s4696_s0 + $0xc0] sm:$0xf] }
  0x55   :  { %1457 = vmatmul.bf16.gmra.mxu3 %v2488_v42  ;;  %v2771_v42 = vld [vmem:[%s4696_s0 + $0xc4] sm:$0xf0] }
  0x61   :  { %953 = vmatmul.bf16.gmra.mxu0 %v2204_v47  ;;  %1133 = vmatmul.bf16.gmra.mxu2 %v2492_v28  ;;  %v2829_v47 = vld [vmem:[%s4696_s0 + $0x294] sm:$0xf0] }
  0x62   :  { %1282 = vmatmul.bf16.gmra.mxu1 %v2208_v48  ;;  %v2500_v48 = vor.u32 %v2829_v47, %v2499_v46  ;;  %v2835_v46 = vld [vmem:[%s4696_s0 + $0x2c4] sm:$0xf0] }
  0x63   :  { %v2524_v47 = vor.u32 %v2835_v46, %v2523_v45  ;;  %v2293_v45 = vld [vmem:[%s4696_s0 + $0xf8] sm:$0xf0] }
  0x65   :  { %1462 = vmatmul.bf16.gmra.mxu3 %v2496_v62  ;;  %v2773_v62 = vld [vmem:[%s4696_s0 + $0xd4] sm:$0xf0] }
  0x71   :  { %958 = vmatmul.bf16.gmra.mxu0 %v2212_v56  ;;  %1138 = vmatmul.bf16.gmra.mxu2 %v2500_v48  ;;  %v2268_v48 = vor.u32 %v2771_v42, %v2267_v39  ;;  %v2291_v39 = vld [vmem:[%s4696_s0 + $0xf0] sm:$0xf]  ;;  %v2533_v42 = vld [vmem:[%s4696_s0 + $0x2d8] sm:$0xf0] }
  0x72   :  { %1287 = vmatmul.bf16.gmra.mxu1 %v2216_v57 }
  0x75   :  { %1467 = vmatmul.bf16.gmra.mxu3 %v2504_v18  ;;  %v2285_v18 = vld [vmem:[%s4696_s0 + $0xe8] sm:$0xf0] }
  0x81   :  { %963 = vmatmul.bf16.gmra.mxu0 %v2220_v4  ;;  %v2508_v4 = vor.u32 %v2831_v3, %v2507_v2  ;;  %v2837_v2 = vld [vmem:[%s4696_s0 + $0x2d4] sm:$0xf0] }
  0x82   :  { %1292 = vmatmul.bf16.gmra.mxu1 %v2224_v5  ;;  %v2252_v5 = vor.u32 %v2767_v63, %v2251_v61  ;;  %v2772_v63 = vld [vmem:[%s4696_s0 + $0xd4] sm:$0xf]  ;;  %v2532_v3 = vor.u32 %v2837_v2, %v2531_v1 }
  0x83   :  { %1143 = vmatmul.bf16.gmra.mxu2 %v2508_v4  ;;  %v2276_v4 = vor.u32 %v2773_v62, %v2275_v59 }
  0x91   :  { %968 = vmatmul.bf16.gmra.mxu0 %v2228_v16 }
  0x92   :  { %1297 = vmatmul.bf16.gmra.mxu1 %v2232_v17  ;;  %v2259_v17 = vld [vmem:[%s4696_s0 + $0xb0] sm:$0xf] }
  0x93   :  { %v2260_v26 = vor.u32 %v2769_v19, %v2259_v17  ;;  %1148 = vmatmul.bf16.gmra.mxu2 %v2516_v24  ;;  %v2774_v17 = vld [vmem:[%s4696_s0 + $0xe4] sm:$0xf] }
  0x94   :  { %v2288_v24 = vor.u32 %v2774_v17, %v2285_v18 }
  0x9e   :  { %v934_v31 = vpop.f32.mrf.mxu0 }
  0x9f   :  { %v1263_v32 = vpop.f32.mrf.mxu1  ;;  %v935_v33 = vadd.f32 %v3150_v25, %v934_v31 }
  0xa1   :  { %v3159_v34 = vadd.f32 %v1263_v32, %v935_v33  ;;  %973 = vmatmul.bf16.gmra.mxu0 %v2236_v29 }
  0xa2   :  { %1302 = vmatmul.bf16.gmra.mxu1 %v2240_v30 }
  0xa3   :  { %1153 = vmatmul.bf16.gmra.mxu2 %v2524_v47 }
  0xa4   :  { %v1114_v19 = vpop.f32.mrf.mxu2 }
  0xa6   :  { %v936_v35 = vpop.f32.mrf.mxu0 }
  0xa7   :  { %v1265_v36 = vpop.f32.mrf.mxu1  ;;  %v937_v37 = vadd.f32 %v3150_v25, %v936_v35 }
  0xa9   :  { %v3168_v40 = vadd.f32 %v1265_v36, %v937_v37  ;;  %v2830_v36 = vld [vmem:[%s4696_s0 + $0x2a4] sm:$0xf]  ;;  %v2509_v37 = vld [vmem:[%s4696_s0 + $0x2a8] sm:$0xf0] }
  0xaa   :  { %v2512_v41 = vor.u32 %v2830_v36, %v2509_v37 }
  0xac   :  { %1472 = vmatmul.bf16.gmra.mxu3 %v2512_v41  ;;  %v2836_v41 = vld [vmem:[%s4696_s0 + $0x2d4] sm:$0xf] }
  0xad   :  { %v2536_v46 = vor.u32 %v2836_v41, %v2533_v42  ;;  %v2843_v41 = vld [vmem:[%s4696_s0 + $0x304] sm:$0xf0] }
  0xae   :  { %v939_v51 = vpop.f32.mrf.mxu0 }
  0xaf   :  { %v1268_v52 = vpop.f32.mrf.mxu1  ;;  %v940_v53 = vadd.f32 %v3150_v25, %v939_v51 }
  0xb1   :  { %v3189_v54 = vadd.f32 %v1268_v52, %v940_v53  ;;  %978 = vmatmul.bf16.gmra.mxu0 %v2244_v49  ;;  %v2272_v49 = vor.u32 %v2770_v43, %v2269_v44  ;;  %v2777_v43 = vld [vmem:[%s4696_s0 + $0xf4] sm:$0xf0]  ;;  %v2776_v44 = vld [vmem:[%s4696_s0 + $0xf4] sm:$0xf] }
  0xb2   :  { %1307 = vmatmul.bf16.gmra.mxu1 %v2248_v50 }
  0xb3   :  { %1158 = vmatmul.bf16.gmra.mxu2 %v2532_v3 }
  0xb6   :  { %v941_v55 = vpop.f32.mrf.mxu0 }
  0xb7   :  { %v1270_v56 = vpop.f32.mrf.mxu1  ;;  %v942_v57 = vadd.f32 %v3150_v25, %v941_v55 }
  0xb9   :  { %v3198_v60 = vadd.f32 %v1270_v56, %v942_v57  ;;  %v2832_v57 = vld [vmem:[%s4696_s0 + $0x2b4] sm:$0xf] }
  0xba   :  { %v2520_v61 = vor.u32 %v2832_v57, %v2517_v58 }
  0xbc   :  { %1477 = vmatmul.bf16.gmra.mxu3 %v2520_v61 }
  0xbe   :  { %v944_v7 = vpop.f32.mrf.mxu0 }
  0xbf   :  { %v1273_v8 = vpop.f32.mrf.mxu1  ;;  %v945_v9 = vadd.f32 %v3150_v25, %v944_v7 }
  0xc1   :  { %v3219_v10 = vadd.f32 %v1273_v8, %v945_v9  ;;  %983 = vmatmul.bf16.gmra.mxu0 %v2252_v5  ;;  %v2280_v5 = vor.u32 %v2772_v63, %v2277_v0 }
  0xc2   :  { %1312 = vmatmul.bf16.gmra.mxu1 %v2256_v6 }
  0xc3   :  { %1163 = vmatmul.bf16.gmra.mxu2 %v2540_v22  ;;  %v1726_v22 = vld [vmem:[%s4697_s3 + $0x78] sm:$0xff] }
  0xc6   :  { %v946_v11 = vpop.f32.mrf.mxu0 }
  0xc7   :  { %v1275_v12 = vpop.f32.mrf.mxu1  ;;  %v947_v13 = vadd.f32 %v3150_v25, %v946_v11  ;;  %v2834_v11 = vld [vmem:[%s4696_s0 + $0x2c4] sm:$0xf] }
  0xc9   :  { %v3228_v16 = vadd.f32 %v1275_v12, %v947_v13  ;;  %v2525_v12 = vld [vmem:[%s4696_s0 + $0x2c8] sm:$0xf0]  ;;  %v2283_v13 = vld [vmem:[%s4696_s0 + $0xe0] sm:$0xf] }
  0xca   :  { %v2528_v14 = vor.u32 %v2834_v11, %v2525_v12  ;;  %v2284_v23 = vor.u32 %v2775_v15, %v2283_v13 }
  0xcc   :  { %1482 = vmatmul.bf16.gmra.mxu3 %v2528_v14 }
  0xce   :  { %v949_v28 = vpop.f32.mrf.mxu0 }
  0xcf   :  { %v1278_v29 = vpop.f32.mrf.mxu1  ;;  %v950_v30 = vadd.f32 %v3150_v25, %v949_v28  ;;  %v1115_v28 = vadd.f32 %v3150_v25, %v1114_v19  ;;  %v2838_v19 = vld [vmem:[%s4696_s0 + $0x2e4] sm:$0xf] }
  0xd1   :  { %v3249_v31 = vadd.f32 %v1278_v29, %v950_v30  ;;  %988 = vmatmul.bf16.gmra.mxu0 %v2260_v26  ;;  %v1443_v29 = vpop.f32.mrf.mxu3 }
  0xd2   :  { %1317 = vmatmul.bf16.gmra.mxu1 %v2264_v27  ;;  %v3340_v30 = vadd.f32 %v1443_v29, %v1115_v28 }
  0xd6   :  { %v951_v32 = vpop.f32.mrf.mxu0 }
  0xd7   :  { %v1280_v33 = vpop.f32.mrf.mxu1  ;;  %v952_v35 = vadd.f32 %v3150_v25, %v951_v32  ;;  %v1116_v32 = vpop.f32.mrf.mxu2 }
  0xd8   :  { %v1117_v36 = vadd.f32 %v3150_v25, %v1116_v32  ;;  %v2301_v32 = vld [vmem:[%s4696_s0 + $0x108] sm:$0xf0] }
  0xd9   :  { %v3258_v38 = vadd.f32 %v1280_v33, %v952_v35  ;;  %v1445_v37 = vpop.f32.mrf.mxu3 }
  0xda   :  { %v3361_v47 = vadd.f32 %v1445_v37, %v1117_v36 }
  0xdc   :  { %1487 = vmatmul.bf16.gmra.mxu3 %v2536_v46 }
  0xde   :  { %v954_v50 = vpop.f32.mrf.mxu0 }
  0xdf   :  { %v1283_v51 = vpop.f32.mrf.mxu1  ;;  %v955_v52 = vadd.f32 %v3150_v25, %v954_v50  ;;  %v2841_v50 = vld [vmem:[%s4696_s0 + $0x2f4] sm:$0xf0] }
  0xe1   :  { %v3279_v53 = vadd.f32 %v1283_v51, %v955_v52  ;;  %993 = vmatmul.bf16.gmra.mxu0 %v2268_v48  ;;  %v1119_v48 = vpop.f32.mrf.mxu2  ;;  %v2292_v51 = vor.u32 %v2777_v43, %v2291_v39  ;;  %v2296_v52 = vor.u32 %v2776_v44, %v2293_v45  ;;  %v1448_v62 = vpop.f32.mrf.mxu3  ;;  %v2555_v39 = vld [vmem:[%s4696_s0 + $0x300] sm:$0xf] }
  0xe2   :  { %1322 = vmatmul.bf16.gmra.mxu1 %v2272_v49  ;;  %v2547_v49 = vld [vmem:[%s4696_s0 + $0x2f0] sm:$0xf]  ;;  %v1120_v61 = vadd.f32 %v3150_v25, %v1119_v48  ;;  %v2556_v45 = vor.u32 %v2843_v41, %v2555_v39 }
  0xe3   :  { %v2548_v57 = vor.u32 %v2841_v50, %v2547_v49  ;;  %v1724_v49 = vld [vmem:[%s4697_s3 + $0x68] sm:$0xff]  ;;  %v1717_v41 = vld [vmem:[%s4697_s3 + $0x30] sm:$0xff] }
  0xe4   :  { %v3371_v0 = vadd.f32 %v1448_v62, %v1120_v61 }
  0xe5   :  { %1168 = vmatmul.bf16.gmra.mxu2 %v2548_v57 }
  0xe6   :  { %v3281_v55 = vpop.f32.mrf.mxu0 }
  0xe7   :  { %v3283_v56 = vpop.f32.mrf.mxu1  ;;  %v957_v36 = vadd.f32 %v3150_v25, %v3281_v55 }
  0xe9   :  { %v1121_v1 = vpop.f32.mrf.mxu2  ;;  %v1450_v14 = vpop.f32.mrf.mxu3 }
  0xea   :  { %v1122_v13 = vadd.f32 %v3150_v25, %v1121_v1  ;;  %v1722_v1 = vld [vmem:[%s4697_s3 + $0x58] sm:$0xff] }
  0xee   :  { %v3309_v6 = vpop.f32.mrf.mxu0 }
  0xef   :  { %v3311_v7 = vpop.f32.mrf.mxu1  ;;  %v960_v21 = vadd.f32 %v3150_v25, %v3309_v6  ;;  %v2778_v6 = vld [vmem:[%s4696_s0 + $0x104] sm:$0xf] }
  0xf0   :  { %v2304_v48 = vor.u32 %v2778_v6, %v2301_v32  ;;  %v1589_v32 = vmax.f32 %v3249_v31, 0.0  ;;  %v2563_v31 = vld [vmem:[%s4696_s0 + $0x310] sm:$0xf] }
  0xf1   :  { %998 = vmatmul.bf16.gmra.mxu0 %v2276_v4  ;;  %v1289_v55 = vadd.f32 %v3311_v7, %v960_v21  ;;  %v1286_v7 = vadd.f32 %v3283_v56, %v957_v36  ;;  %v1721_v56 = vld [vmem:[%s4697_s3 + $0x50] sm:$0xff] }
  0xf2   :  { %1327 = vmatmul.bf16.gmra.mxu1 %v2280_v5  ;;  %v2780_v36 = vld [vmem:[%s4696_s0 + $0x114] sm:$0xf] }
  0xf5   :  { %1173 = vmatmul.bf16.gmra.mxu2 %v2556_v45 }
  0xf6   :  { %v961_v8 = vpop.f32.mrf.mxu0 }
  0xf7   :  { %v3313_v9 = vpop.f32.mrf.mxu1  ;;  %v962_v15 = vadd.f32 %v3150_v25, %v961_v8  ;;  %v2299_v8 = vld [vmem:[%s4696_s0 + $0x100] sm:$0xf] }
  0xf9   :  { %v1291_v37 = vadd.f32 %v3313_v9, %v962_v15  ;;  %v1720_v15 = vld [vmem:[%s4697_s3 + $0x48] sm:$0xff] }
  0xfb   :  { %v1594_v61 = vmax.f32 %v1291_v37, 0.0  ;;  %v2309_v37 = vld [vmem:[%s4696_s0 + $0x118] sm:$0xf0] }
  0xfe   :  { %v964_v26 = vpop.f32.mrf.mxu0 }
  0xff   :  { %v1293_v27 = vpop.f32.mrf.mxu1  ;;  %v965_v5 = vadd.f32 %v3150_v25, %v964_v26 }
 0x101   :  { %1003 = vmatmul.bf16.gmra.mxu0 %v2284_v23  ;;  %v2779_v23 = vld [vmem:[%s4696_s0 + $0x104] sm:$0xf0]  ;;  %v1294_v26 = vadd.f32 %v1293_v27, %v965_v5  ;;  %v1725_v27 = vld [vmem:[%s4697_s3 + $0x70] sm:$0xff] }
 0x102   :  { %1332 = vmatmul.bf16.gmra.mxu1 %v2288_v24  ;;  %v2544_v24 = vor.u32 %v2838_v19, %v2541_v20  ;;  %v2300_v44 = vor.u32 %v2779_v23, %v2299_v8  ;;  %v1590_v8 = vmax.f32 %v3258_v38, 0.0  ;;  %v2307_v38 = vld [vmem:[%s4696_s0 + $0x110] sm:$0xf] }
 0x103   :  { %v1595_v50 = vmax.f32 %v1294_v26, 0.0  ;;  %v2549_v26 = vld [vmem:[%s4696_s0 + $0x2f8] sm:$0xf0] }
 0x104   :  { %1492 = vmatmul.bf16.gmra.mxu3 %v2544_v24 }
 0x106   :  { %v966_v33 = vpop.f32.mrf.mxu0 }
 0x107   :  { %v1295_v35 = vpop.f32.mrf.mxu1  ;;  %v967_v2 = vadd.f32 %v3150_v25, %v966_v33  ;;  %v3401_v33 = vadd.f32 %v1450_v14, %v1122_v13 }
 0x109   :  { %v1296_v17 = vadd.f32 %v1295_v35, %v967_v2  ;;  %v1124_v35 = vpop.f32.mrf.mxu2  ;;  %v1593_v2 = vmax.f32 %v1289_v55, 0.0 }
 0x10a   :  { %v1125_v57 = vadd.f32 %v3150_v25, %v1124_v35 }
 0x10b   :  { %v1596_v42 = vmax.f32 %v1296_v17, 0.0  ;;  %v1591_v17 = vmax.f32 %v3279_v53, 0.0  ;;  %v1849_v19 = vmul.f32 %v1721_v56, %v1593_v2  ;;  %v2840_v53 = vld [vmem:[%s4696_s0 + $0x2f4] sm:$0xf] }
 0x10c   :  { %v2552_v6 = vor.u32 %v2840_v53, %v2549_v26  ;;  %v2782_v26 = vld [vmem:[%s4696_s0 + $0x124] sm:$0xf] }
 0x10e   :  { %v969_v58 = vpop.f32.mrf.mxu0 }
 0x10f   :  { %v1298_v59 = vpop.f32.mrf.mxu1  ;;  %v970_v63 = vadd.f32 %v3150_v25, %v969_v58  ;;  %v1453_v58 = vpop.f32.mrf.mxu3 }
 0x111   :  { %1008 = vmatmul.bf16.gmra.mxu0 %v2292_v51  ;;  %v1299_v11 = vadd.f32 %v1298_v59, %v970_v63  ;;  %v1723_v59 = vld [vmem:[%s4697_s3 + $0x60] sm:$0xff]  ;;  %v1852_v63 = vmul.f32 %v1724_v49, %v1596_v42  ;;  %v1126_v5 = vpop.f32.mrf.mxu2  ;;  %v2845_v42 = vld [vmem:[%s4696_s0 + $0x314] sm:$0xf0]  ;;  %v1716_v49 = vld [vmem:[%s4697_s3 + $0x28] sm:$0xff] }
 0x112   :  { %1337 = vmatmul.bf16.gmra.mxu1 %v2296_v52  ;;  %v1127_v20 = vadd.f32 %v3150_v25, %v1126_v5  ;;  %v2564_v55 = vor.u32 %v2845_v42, %v2563_v31  ;;  %v1584_v5 = vmax.f32 %v3168_v40, 0.0  ;;  %v1711_v40 = vld [vmem:[%s4697_s3] sm:$0xff] }
 0x113   :  { %v1597_v28 = vmax.f32 %v1299_v11, 0.0  ;;  %v1592_v11 = vmax.f32 %v1286_v7, 0.0 }
 0x114   :  { %1497 = vmatmul.bf16.gmra.mxu3 %v2552_v6  ;;  %1178 = vmatmul.bf16.gmra.mxu2 %v2564_v55  ;;  %v2571_v6 = vld [vmem:[%s4696_s0 + $0x320] sm:$0xf] }
 0x115   :  { %v1853_v52 = vmul.f32 %v1725_v27, %v1597_v28  ;;  %v1848_v24 = vmul.f32 %v1720_v15, %v1592_v11  ;;  %v1718_v28 = vld [vmem:[%s4697_s3 + $0x38] sm:$0xff] }
 0x116   :  { %v971_v3 = vpop.f32.mrf.mxu0 }
 0x117   :  { %v1300_v4 = vpop.f32.mrf.mxu1  ;;  %v972_v12 = vadd.f32 %v3150_v25, %v971_v3  ;;  %v1851_v3 = vmul.f32 %v1723_v59, %v1595_v50  ;;  %v1455_v21 = vpop.f32.mrf.mxu3  ;;  %v1587_v50 = vmax.f32 %v3219_v10, 0.0  ;;  %v1586_v59 = vmax.f32 %v3198_v60, 0.0  ;;  %v1714_v10 = vld [vmem:[%s4697_s3 + $0x18] sm:$0xff]  ;;  %v1713_v60 = vld [vmem:[%s4697_s3 + $0x10] sm:$0xff] }
 0x118   :  { %v3469_v27 = vadd.f32 %v1455_v21, %v1127_v20  ;;  %v2842_v21 = vld [vmem:[%s4696_s0 + $0x304] sm:$0xf] }
 0x119   :  { %v1301_v18 = vadd.f32 %v1300_v4, %v972_v12  ;;  %v3430_v4 = vadd.f32 %v1453_v58, %v1125_v57  ;;  %v1850_v12 = vmul.f32 %v1722_v1, %v1594_v61  ;;  %v1129_v39 = vpop.f32.mrf.mxu2  ;;  %v1715_v58 = vld [vmem:[%s4697_s3 + $0x20] sm:$0xff]  ;;  %v1842_v56 = vmul.f32 %v1714_v10, %v1586_v59  ;;  %v2325_v10 = vld [vmem:[%s4696_s0 + $0x138] sm:$0xf0] }
 0x11a   :  { %v1130_v57 = vadd.f32 %v3150_v25, %v1129_v39  ;;  %v1843_v1 = vmul.f32 %v1715_v58, %v1587_v50  ;;  %v2785_v58 = vld [vmem:[%s4696_s0 + $0x134] sm:$0xf0] }
 0x11b   :  { %v1598_v29 = vmax.f32 %v1301_v18, 0.0 }
 0x11d   :  { %v1854_v43 = vmul.f32 %v1726_v22, %v1598_v29  ;;  %v1719_v22 = vld [vmem:[%s4697_s3 + $0x40] sm:$0xff]  ;;  %v2781_v29 = vld [vmem:[%s4696_s0 + $0x114] sm:$0xf0] }
 0x11e   :  { %v974_v9 = vpop.f32.mrf.mxu0  ;;  %v1847_v35 = vmul.f32 %v1719_v22, %v1591_v17  ;;  %v2308_v45 = vor.u32 %v2781_v29, %v2307_v38  ;;  %v2315_v22 = vld [vmem:[%s4696_s0 + $0x120] sm:$0xf] }
 0x11f   :  { %v1303_v46 = vpop.f32.mrf.mxu1  ;;  %v975_v51 = vadd.f32 %v3150_v25, %v974_v9  ;;  %1975 = vmatpush.msrb.mxu2 %v1854_v43  ;;  %v1588_v43 = vmax.f32 %v3228_v16, 0.0  ;;  %v1458_v16 = vpop.f32.mrf.mxu3 }
 0x120   :  { %v3497_v2 = vadd.f32 %v1458_v16, %v1130_v57  ;;  %v2565_v57 = vld [vmem:[%s4696_s0 + $0x318] sm:$0xf0]  ;;  %v2323_v16 = vld [vmem:[%s4696_s0 + $0x130] sm:$0xf] }
 0x121   :  { %v3425_v62 = vadd.f32 %v1303_v46, %v975_v51  ;;  %1013 = vmatmul.bf16.gmra.mxu0 %v2300_v44  ;;  %1976 = vmatpush.msrb.mxu2 %v1853_v52  ;;  %v1846_v44 = vmul.f32 %v1718_v28, %v1590_v8  ;;  %v1845_v52 = vmul.f32 %v1717_v41, %v1589_v32  ;;  %v2783_v8 = vld [vmem:[%s4696_s0 + $0x124] sm:$0xf0]  ;;  %v2317_v28 = vld [vmem:[%s4696_s0 + $0x128] sm:$0xf0] }
 0x122   :  { %1342 = vmatmul.bf16.gmra.mxu1 %v2304_v48  ;;  %v2312_v48 = vor.u32 %v2780_v36, %v2309_v37  ;;  %v1844_v61 = vmul.f32 %v1716_v49, %v1588_v43  ;;  %v2847_v32 = vld [vmem:[%s4696_s0 + $0x324] sm:$0xf0]  ;;  %v2320_v41 = vor.u32 %v2782_v26, %v2317_v28  ;;  %v2573_v26 = vld [vmem:[%s4696_s0 + $0x328] sm:$0xf0]  ;;  %v2331_v28 = vld [vmem:[%s4696_s0 + $0x140] sm:$0xf] }
 0x123   :  { %1977 = vmatpush.msrb.mxu2 %v1852_v63  ;;  %v1585_v63 = vmax.f32 %v3189_v54, 0.0  ;;  %v1583_v54 = vmax.f32 %v3159_v34, 0.0  ;;  %v2557_v34 = vld [vmem:[%s4696_s0 + $0x308] sm:$0xf0]  ;;  %v2572_v36 = vor.u32 %v2847_v32, %v2571_v6  ;;  %v2786_v32 = vld [vmem:[%s4696_s0 + $0x144] sm:$0xf] }
 0x125   :  { %1978 = vmatpush.msrb.mxu2 %v1851_v3  ;;  %v1131_v3 = vpop.f32.mrf.mxu2  ;;  %v1841_v15 = vmul.f32 %v1713_v60, %v1585_v63  ;;  %v1839_v53 = vmul.f32 %v1711_v40, %v1583_v54  ;;  %v2849_v60 = vld [vmem:[%s4696_s0 + $0x334] sm:$0xf0] }
 0x126   :  { %v976_v13 = vpop.f32.mrf.mxu0  ;;  %v1132_v17 = vadd.f32 %v3150_v25, %v1131_v3  ;;  %1183 = vmatmul.bf16.gmra.mxu2 %v2572_v36  ;;  %v2579_v3 = vld [vmem:[%s4696_s0 + $0x330] sm:$0xf] }
 0x127   :  { %v1305_v14 = vpop.f32.mrf.mxu1  ;;  %v977_v18 = vadd.f32 %v3150_v25, %v976_v13  ;;  %1979 = vmatpush.msrb.mxu2 %v1850_v12  ;;  %v1712_v13 = vld [vmem:[%s4697_s3 + $0x8] sm:$0xff] }
 0x128   :  { %v1840_v20 = vmul.f32 %v1712_v13, %v1584_v5  ;;  %v2324_v5 = vor.u32 %v2785_v58, %v2323_v16 }
 0x129   :  { %v3445_v23 = vadd.f32 %v1305_v14, %v977_v18  ;;  %1980 = vmatpush.msrb.mxu2 %v1849_v19  ;;  %v1460_v18 = vpop.f32.mrf.mxu3 }
 0x12a   :  { %v3532_v38 = vadd.f32 %v1460_v18, %v1132_v17 }
 0x12b   :  { %1981 = vmatpush.msrb.mxu2 %v1848_v24  ;;  %v2560_v24 = vor.u32 %v2842_v21, %v2557_v34 }
 0x12d   :  { %1982 = vmatpush.msrb.mxu2 %v1847_v35  ;;  %v1134_v29 = vpop.f32.mrf.mxu2  ;;  %1502 = vmatmul.bf16.gmra.mxu3 %v2560_v24  ;;  %v2316_v35 = vor.u32 %v2783_v8, %v2315_v22 }
 0x12e   :  { %v979_v9 = vpop.f32.mrf.mxu0  ;;  %v1135_v42 = vadd.f32 %v3150_v25, %v1134_v29  ;;  %v2787_v29 = vld [vmem:[%s4696_s0 + $0x144] sm:$0xf0] }
 0x12f   :  { %v1308_v46 = vpop.f32.mrf.mxu1  ;;  %v980_v51 = vadd.f32 %v3150_v25, %v979_v9  ;;  %1983 = vmatpush.msrb.mxu2 %v1846_v44 }
 0x131   :  { %v3491_v7 = vadd.f32 %v1308_v46, %v980_v51  ;;  %1018 = vmatmul.bf16.gmra.mxu0 %v2308_v45  ;;  %1984 = vmatpush.msrb.mxu2 %v1845_v52  ;;  %v1463_v43 = vpop.f32.mrf.mxu3  ;;  %v2844_v52 = vld [vmem:[%s4696_s0 + $0x314] sm:$0xf] }
 0x132   :  { %1347 = vmatmul.bf16.gmra.mxu1 %v2312_v48  ;;  %v3544_v45 = vadd.f32 %v1463_v43, %v1135_v42  ;;  %v2568_v59 = vor.u32 %v2844_v52, %v2565_v57 }
 0x133   :  { %1985 = vmatpush.msrb.mxu2 %v1844_v61  ;;  %v2784_v61 = vld [vmem:[%s4696_s0 + $0x134] sm:$0xf] }
 0x134   :  { %v2328_v13 = vor.u32 %v2784_v61, %v2325_v10  ;;  %v2848_v10 = vld [vmem:[%s4696_s0 + $0x334] sm:$0xf] }
 0x135   :  { %1986 = vmatpush.msrb.mxu2 %v1843_v1  ;;  %v1136_v55 = vpop.f32.mrf.mxu2 }
 0x136   :  { %v981_v11 = vpop.f32.mrf.mxu0  ;;  %v1137_v49 = vadd.f32 %v3150_v25, %v1136_v55 }
 0x137   :  { %v1310_v12 = vpop.f32.mrf.mxu1  ;;  %v982_v14 = vadd.f32 %v3150_v25, %v981_v11  ;;  %1987 = vmatpush.msrb.mxu2 %v1842_v56  ;;  %v2580_v56 = vor.u32 %v2849_v60, %v2579_v3  ;;  %v2339_v3 = vld [vmem:[%s4696_s0 + $0x150] sm:$0xf]  ;;  %v2789_v60 = vld [vmem:[%s4696_s0 + $0x154] sm:$0xf0] }
 0x139   :  { %v3512_v19 = vadd.f32 %v1310_v12, %v982_v14  ;;  %1988 = vmatpush.msrb.mxu2 %v1841_v15  ;;  %v1465_v50 = vpop.f32.mrf.mxu3 }
 0x13a   :  { %v3568_v63 = vadd.f32 %v1465_v50, %v1137_v49  ;;  %1188 = vmatmul.bf16.gmra.mxu2 %v2580_v56  ;;  %v2788_v56 = vld [vmem:[%s4696_s0 + $0x154] sm:$0xf] }
 0x13b   :  { %1989 = vmatpush.msrb.mxu2 %v1840_v20 }
 0x13d   :  { %1990 = vmatpush.msrb.mxu2 %v1839_v53  ;;  %v1139_v1 = vpop.f32.mrf.mxu2  ;;  %1507 = vmatmul.bf16.gmra.mxu3 %v2568_v59  ;;  %v2846_v53 = vld [vmem:[%s4696_s0 + $0x324] sm:$0xf] }
 0x13e   :  { %v984_v37 = vpop.f32.mrf.mxu0  ;;  %v1140_v14 = vadd.f32 %v3150_v25, %v1139_v1  ;;  %v2576_v6 = vor.u32 %v2846_v53, %v2573_v26  ;;  %v2581_v1 = vld [vmem:[%s4696_s0 + $0x338] sm:$0xf0] }
 0x13f   :  { %v1313_v39 = vpop.f32.mrf.mxu1  ;;  %v985_v31 = vadd.f32 %v3150_v25, %v984_v37 }
 0x141   :  { %v3542_v44 = vadd.f32 %v1313_v39, %v985_v31  ;;  %1023 = vmatmul.bf16.gmra.mxu0 %v2316_v35  ;;  %v1468_v15 = vpop.f32.mrf.mxu3  ;;  %v2333_v35 = vld [vmem:[%s4696_s0 + $0x148] sm:$0xf0]  ;;  %v2587_v39 = vld [vmem:[%s4696_s0 + $0x340] sm:$0xf]  ;;  %v2332_v31 = vor.u32 %v2787_v29, %v2331_v28 }
 0x142   :  { %1352 = vmatmul.bf16.gmra.mxu1 %v2320_v41  ;;  %v3580_v18 = vadd.f32 %v1468_v15, %v1140_v14  ;;  %v2851_v41 = vld [vmem:[%s4696_s0 + $0x344] sm:$0xf0]  ;;  %v2853_v14 = vld [vmem:[%s4696_s0 + $0x354] sm:$0xf0]  ;;  %v2340_v15 = vor.u32 %v2789_v60, %v2339_v3 }
 0x143   :  { %v2588_v42 = vor.u32 %v2851_v41, %v2587_v39  ;;  %v2347_v39 = vld [vmem:[%s4696_s0 + $0x160] sm:$0xf]  ;;  %v2791_v41 = vld [vmem:[%s4696_s0 + $0x164] sm:$0xf0] }
 0x145   :  { %v1141_v40 = vpop.f32.mrf.mxu2 }
 0x146   :  { %v986_v9 = vpop.f32.mrf.mxu0  ;;  %v1142_v22 = vadd.f32 %v3150_v25, %v1141_v40 }
 0x147   :  { %v1315_v46 = vpop.f32.mrf.mxu1  ;;  %v987_v48 = vadd.f32 %v3150_v25, %v986_v9  ;;  %v2336_v9 = vor.u32 %v2786_v32, %v2333_v35  ;;  %v2850_v35 = vld [vmem:[%s4696_s0 + $0x344] sm:$0xf] }
 0x149   :  { %v3548_v51 = vadd.f32 %v1315_v46, %v987_v48  ;;  %v1470_v8 = vpop.f32.mrf.mxu3 }
 0x14a   :  { %v3604_v36 = vadd.f32 %v1470_v8, %v1142_v22  ;;  %1193 = vmatmul.bf16.gmra.mxu2 %v2588_v42  ;;  %v2790_v42 = vld [vmem:[%s4696_s0 + $0x164] sm:$0xf] }
 0x14d   :  { %v1144_v37 = vpop.f32.mrf.mxu2  ;;  %1512 = vmatmul.bf16.gmra.mxu3 %v2576_v6 }
 0x14e   :  { %v989_v11 = vpop.f32.mrf.mxu0  ;;  %v1145_v48 = vadd.f32 %v3150_v25, %v1144_v37  ;;  %v2589_v37 = vld [vmem:[%s4696_s0 + $0x348] sm:$0xf0] }
 0x14f   :  { %v1318_v12 = vpop.f32.mrf.mxu1  ;;  %v990_v54 = vadd.f32 %v3150_v25, %v989_v11  ;;  %v2341_v11 = vld [vmem:[%s4696_s0 + $0x158] sm:$0xf0] }
 0x151   :  { %v3578_v17 = vadd.f32 %v1318_v12, %v990_v54  ;;  %1028 = vmatmul.bf16.gmra.mxu0 %v2324_v5  ;;  %v1473_v49 = vpop.f32.mrf.mxu3  ;;  %v2584_v5 = vor.u32 %v2848_v10, %v2581_v1  ;;  %v2595_v54 = vld [vmem:[%s4696_s0 + $0x350] sm:$0xf] }
 0x152   :  { %1357 = vmatmul.bf16.gmra.mxu1 %v2328_v13  ;;  %v3616_v52 = vadd.f32 %v1473_v49, %v1145_v48  ;;  %v2596_v40 = vor.u32 %v2853_v14, %v2595_v54  ;;  %v2603_v48 = vld [vmem:[%s4696_s0 + $0x360] sm:$0xf]  ;;  %v2855_v49 = vld [vmem:[%s4696_s0 + $0x364] sm:$0xf0] }
 0x155   :  { %v1146_v57 = vpop.f32.mrf.mxu2 }
 0x156   :  { %v991_v20 = vpop.f32.mrf.mxu0  ;;  %v1147_v59 = vadd.f32 %v3150_v25, %v1146_v57  ;;  %v2348_v57 = vor.u32 %v2791_v41, %v2347_v39 }
 0x157   :  { %v1320_v21 = vpop.f32.mrf.mxu1  ;;  %v992_v34 = vadd.f32 %v3150_v25, %v991_v20 }
 0x159   :  { %v3584_v24 = vadd.f32 %v1320_v21, %v992_v34  ;;  %v1475_v61 = vpop.f32.mrf.mxu3  ;;  %v2344_v34 = vor.u32 %v2788_v56, %v2341_v11 }
 0x15a   :  { %v3641_v12 = vadd.f32 %v1475_v61, %v1147_v59  ;;  %1198 = vmatmul.bf16.gmra.mxu2 %v2596_v40  ;;  %v2604_v59 = vor.u32 %v2855_v49, %v2603_v48  ;;  %v2597_v40 = vld [vmem:[%s4696_s0 + $0x358] sm:$0xf0] }
 0x15d   :  { %v1149_v13 = vpop.f32.mrf.mxu2  ;;  %1517 = vmatmul.bf16.gmra.mxu3 %v2584_v5 }
 0x15e   :  { %v994_v43 = vpop.f32.mrf.mxu0  ;;  %v1150_v22 = vadd.f32 %v3150_v25, %v1149_v13 }
 0x15f   :  { %v1323_v55 = vpop.f32.mrf.mxu1  ;;  %v995_v46 = vadd.f32 %v3150_v25, %v994_v43  ;;  %v2349_v43 = vld [vmem:[%s4696_s0 + $0x168] sm:$0xf0] }
 0x160   :  { %v2352_v1 = vor.u32 %v2790_v42, %v2349_v43 }
 0x161   :  { %v3614_v50 = vadd.f32 %v1323_v55, %v995_v46  ;;  %1033 = vmatmul.bf16.gmra.mxu0 %v2332_v31  ;;  %v1478_v8 = vpop.f32.mrf.mxu3  ;;  %v2592_v31 = vor.u32 %v2850_v35, %v2589_v37  ;;  %v2857_v35 = vld [vmem:[%s4696_s0 + $0x374] sm:$0xf0] }
 0x162   :  { %1362 = vmatmul.bf16.gmra.mxu1 %v2336_v9  ;;  %v3654_v53 = vadd.f32 %v1478_v8, %v1150_v22  ;;  %v2793_v22 = vld [vmem:[%s4696_s0 + $0x174] sm:$0xf0] }
 0x165   :  { %v1151_v26 = vpop.f32.mrf.mxu2 }
 0x166   :  { %v3618_v16 = vpop.f32.mrf.mxu0  ;;  %v1152_v6 = vadd.f32 %v3150_v25, %v1151_v26  ;;  %v2792_v26 = vld [vmem:[%s4696_s0 + $0x174] sm:$0xf] }
 0x167   :  { %v3620_v58 = vpop.f32.mrf.mxu1 }
 0x169   :  { %v1480_v32 = vpop.f32.mrf.mxu3 }
 0x16a   :  { %v3679_v55 = vadd.f32 %v1480_v32, %v1152_v6  ;;  %1203 = vmatmul.bf16.gmra.mxu2 %v2604_v59  ;;  %v2357_v6 = vld [vmem:[%s4696_s0 + $0x178] sm:$0xf0]  ;;  %v2611_v32 = vld [vmem:[%s4696_s0 + $0x370] sm:$0xf] }
 0x16b   :  { %v2612_v41 = vor.u32 %v2857_v35, %v2611_v32  ;;  %v2360_v43 = vor.u32 %v2792_v26, %v2357_v6  ;;  %v1742_v6 = vld [vmem:[%s4697_s3 + $0xf8] sm:$0xff] }
 0x16d   :  { %v1154_v9 = vpop.f32.mrf.mxu2  ;;  %1522 = vmatmul.bf16.gmra.mxu3 %v2592_v31 }
 0x16e   :  { %v3649_v20 = vpop.f32.mrf.mxu0  ;;  %v1155_v46 = vadd.f32 %v3150_v25, %v1154_v9 }
 0x16f   :  { %v3651_v21 = vpop.f32.mrf.mxu1 }
 0x171   :  { %1038 = vmatmul.bf16.gmra.mxu0 %v2340_v15  ;;  %v1483_v3 = vpop.f32.mrf.mxu3  ;;  %v2852_v15 = vld [vmem:[%s4696_s0 + $0x354] sm:$0xf] }
 0x172   :  { %1367 = vmatmul.bf16.gmra.mxu1 %v2344_v34  ;;  %v3688_v60 = vadd.f32 %v1483_v3, %v1155_v46  ;;  %v2355_v34 = vld [vmem:[%s4696_s0 + $0x170] sm:$0xf]  ;;  %v2600_v8 = vor.u32 %v2852_v15, %v2597_v40 }
 0x173   :  { %v2356_v37 = vor.u32 %v2793_v22, %v2355_v34  ;;  %v3728_v34 = vld [vmem:[%s4695_s2] ss:$0 sm:$0xff] }
 0x174   :  { %v1000_v35 = vadd.f32 %v3728_v34, %v3649_v20  ;;  %v1741_v20 = vld [vmem:[%s4697_s3 + $0xf0] sm:$0xff] }
 0x175   :  { %v1156_v5 = vpop.f32.mrf.mxu2 }
 0x176   :  { %v3656_v28 = vpop.f32.mrf.mxu0  ;;  %v1157_v13 = vadd.f32 %v3150_v25, %v1156_v5 }
 0x177   :  { %v3658_v29 = vpop.f32.mrf.mxu1  ;;  %v1002_v22 = vadd.f32 %v3728_v34, %v3656_v28  ;;  %v2363_v28 = vld [vmem:[%s4696_s0 + $0x180] sm:$0xf] }
 0x179   :  { %v1485_v54 = vpop.f32.mrf.mxu3 }
 0x17a   :  { %v3691_v14 = vadd.f32 %v1485_v54, %v1157_v13  ;;  %1208 = vmatmul.bf16.gmra.mxu2 %v2612_v41 }
 0x17d   :  { %1527 = vmatmul.bf16.gmra.mxu3 %v2600_v8  ;;  %v1159_v39 = vpop.f32.mrf.mxu2 }
 0x17e   :  { %v1004_v61 = vpop.f32.mrf.mxu0  ;;  %v1160_v9 = vadd.f32 %v3150_v25, %v1159_v39 }
 0x17f   :  { %v1333_v10 = vpop.f32.mrf.mxu1  ;;  %v1005_v13 = vadd.f32 %v3150_v25, %v1004_v61  ;;  %v2854_v61 = vld [vmem:[%s4696_s0 + $0x364] sm:$0xf] }
 0x181   :  { %1043 = vmatmul.bf16.gmra.mxu0 %v2348_v57  ;;  %v1488_v46 = vpop.f32.mrf.mxu3 }
 0x182   :  { %1372 = vmatmul.bf16.gmra.mxu1 %v2352_v1  ;;  %v3718_v48 = vadd.f32 %v1488_v46, %v1160_v9  ;;  %v1331_v9 = vadd.f32 %v3658_v29, %v1002_v22  ;;  %v2859_v46 = vld [vmem:[%s4696_s0 + $0x384] sm:$0xf0] }
 0x185   :  { %v1161_v59 = vpop.f32.mrf.mxu2 }
 0x186   :  { %v1006_v56 = vpop.f32.mrf.mxu0  ;;  %v1162_v5 = vadd.f32 %v3150_v25, %v1161_v59 }
 0x187   :  { %v1335_v11 = vpop.f32.mrf.mxu1  ;;  %v1007_v57 = vadd.f32 %v3150_v25, %v1006_v56 }
 0x189   :  { %v1490_v40 = vpop.f32.mrf.mxu3  ;;  %v1336_v8 = vadd.f32 %v1335_v11, %v1007_v57  ;;  %v2795_v11 = vld [vmem:[%s4696_s0 + $0x184] sm:$0xf0] }
 0x18a   :  { %v3732_v56 = vadd.f32 %v1490_v40, %v1162_v5  ;;  %v2364_v59 = vor.u32 %v2795_v11, %v2363_v28  ;;  %v1740_v5 = vld [vmem:[%s4697_s3 + $0xe8] sm:$0xff]  ;;  %v1610_v28 = vmax.f32 %v1331_v9, 0.0 }
 0x18e   :  { %v1009_v31 = vpop.f32.mrf.mxu0 }
 0x18f   :  { %v1338_v42 = vpop.f32.mrf.mxu1  ;;  %v1010_v49 = vadd.f32 %v3150_v25, %v1009_v31  ;;  %v2794_v31 = vld [vmem:[%s4696_s0 + $0x184] sm:$0xf] }
 0x191   :  { %1048 = vmatmul.bf16.gmra.mxu0 %v2356_v37  ;;  %v1339_v54 = vadd.f32 %v1338_v42, %v1010_v49  ;;  %v1334_v37 = vadd.f32 %v1333_v10, %v1005_v13  ;;  %v2365_v42 = vld [vmem:[%s4696_s0 + $0x188] sm:$0xf0]  ;;  %v2619_v10 = vld [vmem:[%s4696_s0 + $0x380] sm:$0xf]  ;;  %v1612_v49 = vmax.f32 %v1336_v8, 0.0 }
 0x192   :  { %1377 = vmatmul.bf16.gmra.mxu1 %v2360_v43  ;;  %v997_v43 = vadd.f32 %v3728_v34, %v3618_v16  ;;  %v2620_v16 = vor.u32 %v2859_v46, %v2619_v10  ;;  %v2368_v29 = vor.u32 %v2794_v31, %v2365_v42 }
 0x193   :  { %v1613_v39 = vmax.f32 %v1339_v54, 0.0  ;;  %v1329_v54 = vadd.f32 %v3651_v21, %v1000_v35  ;;  %v1868_v21 = vmul.f32 %v1740_v5, %v1612_v49  ;;  %v2613_v5 = vld [vmem:[%s4696_s0 + $0x378] sm:$0xf0] }
 0x194   :  { %1213 = vmatmul.bf16.gmra.mxu2 %v2620_v16  ;;  %v1606_v16 = vmax.f32 %v3584_v24, 0.0  ;;  %v2371_v24 = vld [vmem:[%s4696_s0 + $0x190] sm:$0xf] }
 0x195   :  { %v1869_v8 = vmul.f32 %v1741_v20, %v1613_v39  ;;  %v1609_v35 = vmax.f32 %v1329_v54, 0.0  ;;  %v1737_v39 = vld [vmem:[%s4697_s3 + $0xd0] sm:$0xff]  ;;  %v1607_v20 = vmax.f32 %v3614_v50, 0.0  ;;  %v2797_v54 = vld [vmem:[%s4696_s0 + $0x194] sm:$0xf0] }
 0x196   :  { %v1011_v1 = vpop.f32.mrf.mxu0  ;;  %v2856_v50 = vld [vmem:[%s4696_s0 + $0x374] sm:$0xf] }
 0x197   :  { %v1340_v3 = vpop.f32.mrf.mxu1  ;;  %v1012_v15 = vadd.f32 %v3150_v25, %v1011_v1  ;;  %v2605_v25 = vld [vmem:[%s4696_s0 + $0x368] sm:$0xf0]  ;;  %v1164_v1 = vpop.f32.mrf.mxu2  ;;  %v1865_v49 = vmul.f32 %v1737_v39, %v1609_v35 }
 0x198   :  { %v2608_v32 = vor.u32 %v2854_v61, %v2605_v25  ;;  %v1165_v13 = vadd.f32 %v3728_v34, %v1164_v1  ;;  %v1739_v61 = vld [vmem:[%s4697_s3 + $0xe0] sm:$0xff] }
 0x199   :  { %v1341_v26 = vadd.f32 %v1340_v3, %v1012_v15  ;;  %v1611_v15 = vmax.f32 %v1334_v37, 0.0 }
 0x19a   :  { %1532 = vmatmul.bf16.gmra.mxu3 %v2608_v32  ;;  %v1738_v32 = vld [vmem:[%s4697_s3 + $0xd8] sm:$0xff] }
 0x19b   :  { %v1614_v41 = vmax.f32 %v1341_v26, 0.0  ;;  %v1493_v26 = vpop.f32.mrf.mxu3  ;;  %v1867_v37 = vmul.f32 %v1739_v61, %v1611_v15  ;;  %v2616_v15 = vor.u32 %v2856_v50, %v2613_v5  ;;  %v1733_v61 = vld [vmem:[%s4697_s3 + $0xb0] sm:$0xff] }
 0x19c   :  { %v3778_v25 = vadd.f32 %v1493_v26, %v1165_v13  ;;  %v1734_v13 = vld [vmem:[%s4697_s3 + $0xb8] sm:$0xff]  ;;  %v1729_v50 = vld [vmem:[%s4697_s3 + $0x90] sm:$0xff] }
 0x19d   :  { %v1870_v57 = vmul.f32 %v1742_v6, %v1614_v41  ;;  %v1326_v6 = vadd.f32 %v3620_v58, %v997_v43  ;;  %v1866_v58 = vmul.f32 %v1738_v32, %v1610_v28  ;;  %v1736_v43 = vld [vmem:[%s4697_s3 + $0xc8] sm:$0xff]  ;;  %v2373_v26 = vld [vmem:[%s4696_s0 + $0x198] sm:$0xf0]  ;;  %v1604_v28 = vmax.f32 %v3548_v51, 0.0 }
 0x19e   :  { %v1014_v3 = vpop.f32.mrf.mxu0  ;;  %v2372_v32 = vor.u32 %v2797_v54, %v2371_v24  ;;  %v1728_v54 = vld [vmem:[%s4697_s3 + $0x88] sm:$0xff] }
 0x19f   :  { %v1015_v40 = vadd.f32 %v3728_v34, %v1014_v3  ;;  %1995 = vmatpush.msrb.mxu3 %v1870_v57  ;;  %v1343_v22 = vpop.f32.mrf.mxu1  ;;  %v1608_v41 = vmax.f32 %v1326_v6, 0.0  ;;  %v1166_v31 = vpop.f32.mrf.mxu2  ;;  %v2627_v6 = vld [vmem:[%s4696_s0 + $0x390] sm:$0xf] }
 0x1a0   :  { %v1167_v9 = vadd.f32 %v3728_v34, %v1166_v31 }
 0x1a1   :  { %v3781_v11 = vadd.f32 %v1343_v22, %v1015_v40  ;;  %1053 = vmatmul.bf16.gmra.mxu0 %v2364_v59  ;;  %1996 = vmatpush.msrb.mxu3 %v1869_v8  ;;  %v1735_v59 = vld [vmem:[%s4697_s3 + $0xc0] sm:$0xff]  ;;  %v1605_v40 = vmax.f32 %v3578_v17, 0.0  ;;  %v2796_v8 = vld [vmem:[%s4696_s0 + $0x194] sm:$0xf]  ;;  %v2861_v17 = vld [vmem:[%s4696_s0 + $0x394] sm:$0xf0] }
 0x1a2   :  { %1382 = vmatmul.bf16.gmra.mxu1 %v2368_v29  ;;  %v1864_v29 = vmul.f32 %v1736_v43, %v1608_v41  ;;  %v1863_v22 = vmul.f32 %v1735_v59, %v1607_v20  ;;  %v2376_v41 = vor.u32 %v2796_v8, %v2373_v26  ;;  %v1730_v59 = vld [vmem:[%s4697_s3 + $0x98] sm:$0xff] }
 0x1a3   :  { %1997 = vmatpush.msrb.mxu3 %v1868_v21  ;;  %v1495_v57 = vpop.f32.mrf.mxu3  ;;  %v1862_v21 = vmul.f32 %v1734_v13, %v1606_v16  ;;  %v1861_v51 = vmul.f32 %v1733_v61, %v1605_v40  ;;  %v1601_v16 = vmax.f32 %v3491_v7, 0.0  ;;  %v1599_v7 = vmax.f32 %v3425_v62, 0.0  ;;  %v2858_v62 = vld [vmem:[%s4696_s0 + $0x384] sm:$0xf] }
 0x1a4   :  { %v3798_v1 = vadd.f32 %v1495_v57, %v1167_v9 }
 0x1a5   :  { %1998 = vmatpush.msrb.mxu3 %v1867_v37  ;;  %v2628_v37 = vor.u32 %v2861_v17, %v2627_v6  ;;  %v1857_v8 = vmul.f32 %v1729_v50, %v1601_v16 }
 0x1a6   :  { %v1016_v42 = vpop.f32.mrf.mxu0 }
 0x1a7   :  { %v1017_v10 = vadd.f32 %v3728_v34, %v1016_v42  ;;  %1999 = vmatpush.msrb.mxu3 %v1866_v58  ;;  %v1345_v46 = vpop.f32.mrf.mxu1  ;;  %v1169_v35 = vpop.f32.mrf.mxu2  ;;  %v1732_v58 = vld [vmem:[%s4697_s3 + $0xa8] sm:$0xff]  ;;  %v1603_v42 = vmax.f32 %v3542_v44, 0.0  ;;  %1218 = vmatmul.bf16.gmra.mxu2 %v2628_v37 }
 0x1a8   :  { %v1170_v31 = vadd.f32 %v3728_v34, %v1169_v35  ;;  %v1860_v44 = vmul.f32 %v1732_v58, %v1604_v28  ;;  %v2621_v28 = vld [vmem:[%s4696_s0 + $0x388] sm:$0xf0]  ;;  %v2635_v58 = vld [vmem:[%s4696_s0 + $0x3a0] sm:$0xf] }
 0x1a9   :  { %v3801_v3 = vadd.f32 %v1345_v46, %v1017_v10  ;;  %2000 = vmatpush.msrb.mxu3 %v1865_v49  ;;  %v1731_v10 = vld [vmem:[%s4697_s3 + $0xa0] sm:$0xff]  ;;  %v1602_v49 = vmax.f32 %v3512_v19, 0.0  ;;  %v1600_v19 = vmax.f32 %v3445_v23, 0.0  ;;  %v2624_v35 = vor.u32 %v2858_v62, %v2621_v28  ;;  %v2389_v62 = vld [vmem:[%s4696_s0 + $0x1b8] sm:$0xf0] }
 0x1aa   :  { %1537 = vmatmul.bf16.gmra.mxu3 %v2616_v15  ;;  %v1727_v23 = vld [vmem:[%s4697_s3 + $0x80] sm:$0xff]  ;;  %v2643_v28 = vld [vmem:[%s4696_s0 + $0x3b0] sm:$0xf] }
 0x1ab   :  { %2001 = vmatpush.msrb.mxu3 %v1864_v29  ;;  %v1498_v20 = vpop.f32.mrf.mxu3  ;;  %v1859_v29 = vmul.f32 %v1731_v10, %v1603_v42  ;;  %v1858_v5 = vmul.f32 %v1730_v59, %v1602_v49  ;;  %v1856_v17 = vmul.f32 %v1728_v54, %v1600_v19  ;;  %v1855_v37 = vmul.f32 %v1727_v23, %v1599_v7 }
 0x1ac   :  { %v3844_v46 = vadd.f32 %v1498_v20, %v1170_v31  ;;  %v2863_v31 = vld [vmem:[%s4696_s0 + $0x3a4] sm:$0xf0] }
 0x1ad   :  { %2002 = vmatpush.msrb.mxu3 %v1863_v22 }
 0x1ae   :  { %v1019_v39 = vpop.f32.mrf.mxu0 }
 0x1af   :  { %v1020_v43 = vadd.f32 %v3728_v34, %v1019_v39  ;;  %2003 = vmatpush.msrb.mxu3 %v1862_v21  ;;  %v1348_v9 = vpop.f32.mrf.mxu1  ;;  %v1171_v13 = vpop.f32.mrf.mxu2  ;;  %v2379_v21 = vld [vmem:[%s4696_s0 + $0x1a0] sm:$0xf]  ;;  %v2798_v39 = vld [vmem:[%s4696_s0 + $0x1a4] sm:$0xf] }
 0x1b0   :  { %v1172_v15 = vadd.f32 %v3728_v34, %v1171_v13 }
 0x1b1   :  { %v3847_v57 = vadd.f32 %v1348_v9, %v1020_v43  ;;  %1058 = vmatmul.bf16.gmra.mxu0 %v2372_v32  ;;  %2004 = vmatpush.msrb.mxu3 %v1861_v51  ;;  %v2799_v32 = vld [vmem:[%s4696_s0 + $0x1a4] sm:$0xf0]  ;;  %v2636_v9 = vor.u32 %v2863_v31, %v2635_v58 }
 0x1b2   :  { %1387 = vmatmul.bf16.gmra.mxu1 %v2376_v41  ;;  %v2381_v41 = vld [vmem:[%s4696_s0 + $0x1a8] sm:$0xf0]  ;;  %v2380_v42 = vor.u32 %v2799_v32, %v2379_v21  ;;  %v2865_v21 = vld [vmem:[%s4696_s0 + $0x3b4] sm:$0xf0] }
 0x1b3   :  { %2005 = vmatpush.msrb.mxu3 %v1860_v44  ;;  %v1500_v26 = vpop.f32.mrf.mxu3  ;;  %v2384_v20 = vor.u32 %v2798_v39, %v2381_v41 }
 0x1b4   :  { %v3866_v61 = vadd.f32 %v1500_v26, %v1172_v15  ;;  %v2801_v26 = vld [vmem:[%s4696_s0 + $0x1b4] sm:$0xf0] }
 0x1b5   :  { %2006 = vmatpush.msrb.mxu3 %v1859_v29 }
 0x1b6   :  { %v1021_v24 = vpop.f32.mrf.mxu0 }
 0x1b7   :  { %v1022_v40 = vadd.f32 %v3728_v34, %v1021_v24  ;;  %2007 = vmatpush.msrb.mxu3 %v1858_v5  ;;  %v1350_v22 = vpop.f32.mrf.mxu1  ;;  %v1174_v43 = vpop.f32.mrf.mxu2  ;;  %1223 = vmatmul.bf16.gmra.mxu2 %v2636_v9 }
 0x1b8   :  { %v1175_v10 = vadd.f32 %v3728_v34, %v1174_v43 }
 0x1b9   :  { %v3868_v6 = vadd.f32 %v1350_v22, %v1022_v40  ;;  %2008 = vmatpush.msrb.mxu3 %v1857_v8  ;;  %v2860_v40 = vld [vmem:[%s4696_s0 + $0x394] sm:$0xf]  ;;  %v2629_v22 = vld [vmem:[%s4696_s0 + $0x398] sm:$0xf0]  ;;  %v2387_v8 = vld [vmem:[%s4696_s0 + $0x1b0] sm:$0xf] }
 0x1ba   :  { %1542 = vmatmul.bf16.gmra.mxu3 %v2624_v35  ;;  %v2632_v23 = vor.u32 %v2860_v40, %v2629_v22  ;;  %v2388_v32 = vor.u32 %v2801_v26, %v2387_v8  ;;  %v2803_v40 = vld [vmem:[%s4696_s0 + $0x1c4] sm:$0xf0]  ;;  %v2802_v8 = vld [vmem:[%s4696_s0 + $0x1c4] sm:$0xf]  ;;  %v2397_v26 = vld [vmem:[%s4696_s0 + $0x1c8] sm:$0xf0] }
 0x1bb   :  { %2009 = vmatpush.msrb.mxu3 %v1856_v17  ;;  %v1503_v59 = vpop.f32.mrf.mxu3  ;;  %v2800_v17 = vld [vmem:[%s4696_s0 + $0x1b4] sm:$0xf] }
 0x1bc   :  { %v3896_v16 = vadd.f32 %v1503_v59, %v1175_v10  ;;  %v2392_v41 = vor.u32 %v2800_v17, %v2389_v62  ;;  %v2867_v17 = vld [vmem:[%s4696_s0 + $0x3c4] sm:$0xf0] }
 0x1bd   :  { %2010 = vmatpush.msrb.mxu3 %v1855_v37  ;;  %v2644_v37 = vor.u32 %v2865_v21, %v2643_v28 }
 0x1be   :  { %v1024_v51 = vpop.f32.mrf.mxu0  ;;  %4701 = vst [vmem:[#allocation3_spill] sm:$0xff] %v3896_v16 }
 0x1bf   :  { %v1025_v49 = vadd.f32 %v3728_v34, %v1024_v51  ;;  %v1353_v44 = vpop.f32.mrf.mxu1  ;;  %v1176_v50 = vpop.f32.mrf.mxu2 }
 0x1c0   :  { %v1177_v5 = vadd.f32 %v3728_v34, %v1176_v50 }
 0x1c1   :  { %v3898_v29 = vadd.f32 %v1353_v44, %v1025_v49  ;;  %1063 = vmatmul.bf16.gmra.mxu0 %v2380_v42 }
 0x1c2   :  { %1392 = vmatmul.bf16.gmra.mxu1 %v2384_v20 }
 0x1c3   :  { %v1505_v54 = vpop.f32.mrf.mxu3 }
 0x1c4   :  { %v3902_v15 = vadd.f32 %v1505_v54, %v1177_v5  ;;  %v2395_v54 = vld [vmem:[%s4696_s0 + $0x1c0] sm:$0xf] }
 0x1c5   :  { %v2396_v62 = vor.u32 %v2803_v40, %v2395_v54  ;;  %v2805_v54 = vld [vmem:[%s4696_s0 + $0x1d4] sm:$0xf0] }
 0x1c6   :  { %v1026_v19 = vpop.f32.mrf.mxu0  ;;  %4702 = vst [vmem:[#allocation4_spill] sm:$0xff] %v3902_v15 }
 0x1c7   :  { %v1027_v13 = vadd.f32 %v3728_v34, %v1026_v19  ;;  %v1355_v24 = vpop.f32.mrf.mxu1  ;;  %v1179_v35 = vpop.f32.mrf.mxu2  ;;  %1228 = vmatmul.bf16.gmra.mxu2 %v2644_v37 }
 0x1c8   :  { %v1180_v58 = vadd.f32 %v3728_v34, %v1179_v35  ;;  %v2400_v35 = vor.u32 %v2802_v8, %v2397_v26  ;;  %v2405_v8 = vld [vmem:[%s4696_s0 + $0x1d8] sm:$0xf0]  ;;  %v2659_v26 = vld [vmem:[%s4696_s0 + $0x3d0] sm:$0xf] }
 0x1c9   :  { %v3904_v7 = vadd.f32 %v1355_v24, %v1027_v13  ;;  %v2862_v13 = vld [vmem:[%s4696_s0 + $0x3a4] sm:$0xf]  ;;  %v2637_v24 = vld [vmem:[%s4696_s0 + $0x3a8] sm:$0xf0] }
 0x1ca   :  { %1547 = vmatmul.bf16.gmra.mxu3 %v2632_v23  ;;  %v2640_v22 = vor.u32 %v2862_v13, %v2637_v24  ;;  %v2651_v23 = vld [vmem:[%s4696_s0 + $0x3c0] sm:$0xf]  ;;  %v2645_v13 = vld [vmem:[%s4696_s0 + $0x3b8] sm:$0xf0]  ;;  %v2403_v24 = vld [vmem:[%s4696_s0 + $0x1d0] sm:$0xf] }
 0x1cb   :  { %v1508_v43 = vpop.f32.mrf.mxu3  ;;  %v2652_v21 = vor.u32 %v2867_v17, %v2651_v23  ;;  %v2869_v23 = vld [vmem:[%s4696_s0 + $0x3d4] sm:$0xf0]  ;;  %v2404_v17 = vor.u32 %v2805_v54, %v2403_v24  ;;  %v2866_v24 = vld [vmem:[%s4696_s0 + $0x3c4] sm:$0xf]  ;;  %v2653_v54 = vld [vmem:[%s4696_s0 + $0x3c8] sm:$0xf0] }
 0x1cc   :  { %v3932_v9 = vadd.f32 %v1508_v43, %v1180_v58 }
 0x1ce   :  { %v1029_v39 = vpop.f32.mrf.mxu0  ;;  %4703 = vst [vmem:[#allocation5_spill] sm:$0xff] %v3932_v9 }
 0x1cf   :  { %v1030_v31 = vadd.f32 %v3728_v34, %v1029_v39  ;;  %v1358_v42 = vpop.f32.mrf.mxu1  ;;  %v1181_v20 = vpop.f32.mrf.mxu2 }
 0x1d0   :  { %v1182_v49 = vadd.f32 %v3728_v34, %v1181_v20 }
 0x1d1   :  { %v3934_v51 = vadd.f32 %v1358_v42, %v1030_v31  ;;  %1068 = vmatmul.bf16.gmra.mxu0 %v2388_v32 }
 0x1d2   :  { %1397 = vmatmul.bf16.gmra.mxu1 %v2392_v41 }
 0x1d3   :  { %v1510_v50 = vpop.f32.mrf.mxu3 }
 0x1d4   :  { %v3938_v19 = vadd.f32 %v1510_v50, %v1182_v49  ;;  %v2864_v50 = vld [vmem:[%s4696_s0 + $0x3b4] sm:$0xf] }
 0x1d5   :  { %v2648_v40 = vor.u32 %v2864_v50, %v2645_v13 }
 0x1d6   :  { %v1031_v10 = vpop.f32.mrf.mxu0  ;;  %4704 = vst [vmem:[#allocation6_spill] sm:$0xff] %v3938_v19 }
 0x1d7   :  { %v1032_v44 = vadd.f32 %v3728_v34, %v1031_v10  ;;  %v1360_v59 = vpop.f32.mrf.mxu1  ;;  %v1184_v28 = vpop.f32.mrf.mxu2  ;;  %1233 = vmatmul.bf16.gmra.mxu2 %v2652_v21 }
 0x1d8   :  { %v1185_v37 = vadd.f32 %v3728_v34, %v1184_v28  ;;  %v2660_v28 = vor.u32 %v2869_v23, %v2659_v26  ;;  %v2806_v26 = vld [vmem:[%s4696_s0 + $0x1e4] sm:$0xf]  ;;  %v2413_v23 = vld [vmem:[%s4696_s0 + $0x1e8] sm:$0xf0] }
 0x1d9   :  { %v3940_v5 = vadd.f32 %v1360_v59, %v1032_v44 }
 0x1da   :  { %1552 = vmatmul.bf16.gmra.mxu3 %v2640_v22  ;;  %v2804_v22 = vld [vmem:[%s4696_s0 + $0x1d4] sm:$0xf] }
 0x1db   :  { %v1513_v58 = vpop.f32.mrf.mxu3 }
 0x1dc   :  { %v3968_v31 = vadd.f32 %v1513_v58, %v1185_v37 }
 0x1de   :  { %v1034_v32 = vpop.f32.mrf.mxu0  ;;  %4705 = vst [vmem:[#allocation7_spill] sm:$0xff] %v3968_v31 }
 0x1df   :  { %v1035_v39 = vadd.f32 %v3728_v34, %v1034_v32  ;;  %v1363_v41 = vpop.f32.mrf.mxu1  ;;  %v1186_v43 = vpop.f32.mrf.mxu2  ;;  %v2408_v32 = vor.u32 %v2804_v22, %v2405_v8  ;;  %v2807_v22 = vld [vmem:[%s4696_s0 + $0x1e4] sm:$0xf0]  ;;  %v2656_v8 = vor.u32 %v2866_v24, %v2653_v54 }
 0x1e0   :  { %v1187_v10 = vadd.f32 %v3728_v34, %v1186_v43 }
 0x1e1   :  { %v3970_v42 = vadd.f32 %v1363_v41, %v1035_v39  ;;  %1073 = vmatmul.bf16.gmra.mxu0 %v2396_v62 }
 0x1e2   :  { %1402 = vmatmul.bf16.gmra.mxu1 %v2400_v35 }
 0x1e3   :  { %v1515_v44 = vpop.f32.mrf.mxu3 }
 0x1e4   :  { %v3977_v59 = vadd.f32 %v1515_v44, %v1187_v10 }
 0x1e6   :  { %v3972_v20 = vpop.f32.mrf.mxu0  ;;  %4706 = vst [vmem:[#allocation8_spill] sm:$0xff] %v3977_v59 }
 0x1e7   :  { %v3975_v49 = vpop.f32.mrf.mxu1  ;;  %v1189_v62 = vpop.f32.mrf.mxu2  ;;  %1238 = vmatmul.bf16.gmra.mxu2 %v2660_v28 }
 0x1e8   :  { %v1190_v35 = vadd.f32 %v3728_v34, %v1189_v62  ;;  %v2871_v62 = vld [vmem:[%s4696_s0 + $0x3e4] sm:$0xf0] }
 0x1ea   :  { %1557 = vmatmul.bf16.gmra.mxu3 %v2648_v40  ;;  %v2411_v40 = vld [vmem:[%s4696_s0 + $0x1e0] sm:$0xf] }
 0x1eb   :  { %v1518_v39 = vpop.f32.mrf.mxu3  ;;  %v2412_v28 = vor.u32 %v2807_v22, %v2411_v40  ;;  %v2868_v40 = vld [vmem:[%s4696_s0 + $0x3d4] sm:$0xf]  ;;  %v2661_v22 = vld [vmem:[%s4696_s0 + $0x3d8] sm:$0xf0] }
 0x1ec   :  { %v4008_v41 = vadd.f32 %v1518_v39, %v1190_v35 }
 0x1ee   :  { %v4003_v21 = vpop.f32.mrf.mxu0  ;;  %4707 = vst [vmem:[#allocation9_spill] sm:$0xff] %v4008_v41 }
 0x1ef   :  { %v4006_v37 = vpop.f32.mrf.mxu1  ;;  %v1191_v58 = vpop.f32.mrf.mxu2 }
 0x1f0   :  { %v1192_v10 = vadd.f32 %v3728_v34, %v1191_v58  ;;  %v2416_v58 = vor.u32 %v2806_v26, %v2413_v23  ;;  %v2419_v26 = vld [vmem:[%s4696_s0 + $0x1f0] sm:$0xf]  ;;  %v2809_v23 = vld [vmem:[%s4696_s0 + $0x1f4] sm:$0xf0] }
 0x1f1   :  { %1078 = vmatmul.bf16.gmra.mxu0 %v2404_v17  ;;  %v2667_v17 = vld [vmem:[%s4696_s0 + $0x3e0] sm:$0xf]  ;;  %v2420_v15 = vor.u32 %v2809_v23, %v2419_v26 }
 0x1f2   :  { %1407 = vmatmul.bf16.gmra.mxu1 %v2408_v32  ;;  %v2668_v35 = vor.u32 %v2871_v62, %v2667_v17  ;;  %v2664_v17 = vor.u32 %v2868_v40, %v2661_v22  ;;  %v2808_v62 = vld [vmem:[%s4696_s0 + $0x1f4] sm:$0xf] }
 0x1f3   :  { %v1520_v50 = vpop.f32.mrf.mxu3 }
 0x1f4   :  { %v4013_v13 = vadd.f32 %v1520_v50, %v1192_v10 }
 0x1f6   :  { %v1041_v43 = vpop.f32.mrf.mxu0  ;;  %4708 = vst [vmem:[#allocation10_spill] sm:$0xff] %v4013_v13 }
 0x1f7   :  { %v4011_v44 = vpop.f32.mrf.mxu1  ;;  %v4039_v32 = vpop.f32.mrf.mxu2  ;;  %1243 = vmatmul.bf16.gmra.mxu2 %v2668_v35  ;;  %v2675_v35 = vld [vmem:[%s4696_s0 + $0x3f0] sm:$0xf] }
 0x1f8   :  { %4709 = vst [vmem:[#allocation11_spill] sm:$0xff] %v4039_v32  ;;  %v1756_v32 = vld [vmem:[%s4697_s3 + $0x168] sm:$0xff] }
 0x1fa   :  { %1562 = vmatmul.bf16.gmra.mxu3 %v2656_v8 }
 0x1fb   :  { %v4041_v50 = vpop.f32.mrf.mxu3 }
 0x1fc   :  { %4710 = vst [vmem:[#allocation12_spill] sm:$0xff] %v4041_v50 }
 0x1fe   :  { %v1044_v39 = vpop.f32.mrf.mxu0 }
 0x1ff   :  { %v1373_v10 = vpop.f32.mrf.mxu1  ;;  %v4043_v24 = vpop.f32.mrf.mxu2  ;;  %v1045_v26 = vadd.f32 %v3728_v34, %v1044_v39  ;;  %v2427_v39 = vld [vmem:[%s4696_s0 + $0x200] sm:$0xf] }
 0x200   :  { %4711 = vst [vmem:[#allocation13_spill] sm:$0xff] %v4043_v24 }
 0x201   :  { %1083 = vmatmul.bf16.gmra.mxu0 %v2412_v28  ;;  %v2421_v28 = vld [vmem:[%s4696_s0 + $0x1f8] sm:$0xf0] }
 0x202   :  { %1412 = vmatmul.bf16.gmra.mxu1 %v2416_v58  ;;  %v2873_v58 = vld [vmem:[%s4696_s0 + $0x3f4] sm:$0xf0]  ;;  %v2424_v19 = vor.u32 %v2808_v62, %v2421_v28  ;;  %v1042_v28 = vadd.f32 %v3728_v34, %v1041_v43 }
 0x203   :  { %v4045_v16 = vpop.f32.mrf.mxu3  ;;  %v2676_v40 = vor.u32 %v2873_v58, %v2675_v35 }
 0x204   :  { %4712 = vst [vmem:[#allocation14_spill] sm:$0xff] %v4045_v16  ;;  %v1037_v16 = vadd.f32 %v3728_v34, %v3972_v20  ;;  %v1967_v20 = vld [vmem:[%s4698_s4] sm:$0xff] }
 0x206   :  { %v1046_v54 = vpop.f32.mrf.mxu0 }
 0x207   :  { %v1375_v8 = vpop.f32.mrf.mxu1  ;;  %v4071_v9 = vpop.f32.mrf.mxu2  ;;  %1248 = vmatmul.bf16.gmra.mxu2 %v2676_v40  ;;  %v1047_v41 = vadd.f32 %v3728_v34, %v1046_v54  ;;  %v2669_v54 = vld [vmem:[%s4696_s0 + $0x3e8] sm:$0xf0] }
 0x209   :  { %v1376_v40 = vadd.f32 %v1375_v8, %v1047_v41  ;;  %v2811_v41 = vld [vmem:[%s4696_s0 + $0x204] sm:$0xf0]  ;;  %v1374_v8 = vadd.f32 %v1373_v10, %v1045_v26 }
 0x20a   :  { %1567 = vmatmul.bf16.gmra.mxu3 %v2664_v17 }
 0x20b   :  { %v4073_v59 = vpop.f32.mrf.mxu3  ;;  %v1628_v10 = vmax.f32 %v1376_v40, 0.0  ;;  %v1627_v24 = vmax.f32 %v1374_v8, 0.0 }
 0x20c   :  { %4713 = vst [vmem:[#allocation15_spill] sm:$0xff] %v4073_v59 }
 0x20e   :  { %v1049_v22 = vpop.f32.mrf.mxu0 }
 0x20f   :  { %v1378_v31 = vpop.f32.mrf.mxu1  ;;  %v1050_v17 = vadd.f32 %v3728_v34, %v1049_v22  ;;  %v4077_v13 = vpop.f32.mrf.mxu2 }
 0x211   :  { %1088 = vmatmul.bf16.gmra.mxu0 %v2420_v15  ;;  %v1379_v23 = vadd.f32 %v1378_v31, %v1050_v17  ;;  %v1758_v31 = vld [vmem:[%s4697_s3 + $0x178] sm:$0xff] }
 0x212   :  { %1417 = vmatmul.bf16.gmra.mxu1 %v2424_v19  ;;  %v2870_v19 = vld [vmem:[%s4696_s0 + $0x3e4] sm:$0xf] }
 0x213   :  { %v4081_v62 = vpop.f32.mrf.mxu3  ;;  %v2672_v43 = vor.u32 %v2870_v19, %v2669_v54  ;;  %v1629_v22 = vmax.f32 %v1379_v23, 0.0  ;;  %v1757_v19 = vld [vmem:[%s4697_s3 + $0x170] sm:$0xff]  ;;  %v2428_v23 = vor.u32 %v2811_v41, %v2427_v39  ;;  %v1755_v39 = vld [vmem:[%s4697_s3 + $0x160] sm:$0xff] }
 0x214   :  { %4714 = vst [vmem:[#allocation16_spill] sm:$0xff] %v4081_v62 }
 0x216   :  { %v1051_v50 = vpop.f32.mrf.mxu0 }
 0x217   :  { %v1052_v35 = vadd.f32 %v3728_v34, %v1051_v50  ;;  %v1380_v58 = vpop.f32.mrf.mxu1  ;;  %v1040_v50 = vadd.f32 %v3728_v34, %v4003_v21  ;;  %v1371_v21 = vadd.f32 %v4011_v44, %v1042_v28  ;;  %v1885_v44 = vmul.f32 %v1757_v19, %v1629_v22  ;;  %1991 = vmatmul.f32.vlgmr.msrb.gmra.mxu2 %v1967_v20 }
 0x218   :  { %v1883_v22 = vmul.f32 %v1755_v39, %v1627_v24  ;;  %v2813_v39 = vld [vmem:[%s4696_s0 + $0x214] sm:$0xf0] }
 0x219   :  { %v1381_v15 = vadd.f32 %v1380_v58, %v1052_v35  ;;  %v2810_v35 = vld [vmem:[%s4696_s0 + $0x204] sm:$0xf]  ;;  %v2429_v58 = vld [vmem:[%s4696_s0 + $0x208] sm:$0xf0] }
 0x21a   :  { %1572 = vmatmul.bf16.gmra.mxu3 %v2672_v43  ;;  %v2432_v59 = vor.u32 %v2810_v35, %v2429_v58  ;;  %v1369_v43 = vadd.f32 %v4006_v37, %v1040_v50  ;;  %v1626_v35 = vmax.f32 %v1371_v21, 0.0  ;;  %v1884_v37 = vmul.f32 %v1756_v32, %v1628_v10  ;;  %v1754_v50 = vld [vmem:[%s4697_s3 + $0x158] sm:$0xff] }
 0x21b   :  { %v1630_v17 = vmax.f32 %v1381_v15, 0.0  ;;  %v1204_v15 = vpop.f32.mrf.mxu2  ;;  %v1623_v10 = vmax.f32 %v3970_v42, 0.0  ;;  %v2872_v42 = vld [vmem:[%s4696_s0 + $0x3f4] sm:$0xf] }
 0x21c   :  { %v1205_v62 = vadd.f32 %v3728_v34, %v1204_v15  ;;  %v1625_v8 = vmax.f32 %v1369_v43, 0.0  ;;  %v1622_v43 = vmax.f32 %v3940_v5, 0.0  ;;  %v2435_v5 = vld [vmem:[%s4696_s0 + $0x210] sm:$0xf] }
 0x21d   :  { %v1886_v26 = vmul.f32 %v1758_v31, %v1630_v17  ;;  %v1533_v31 = vpop.f32.mrf.mxu3  ;;  %v1366_v17 = vadd.f32 %v3975_v49, %v1037_v16  ;;  %v1882_v16 = vmul.f32 %v1754_v50, %v1626_v35  ;;  %v1621_v35 = vmax.f32 %v3934_v51, 0.0  ;;  %v2812_v50 = vld [vmem:[%s4696_s0 + $0x214] sm:$0xf] }
 0x21e   :  { %v1054_v54 = vpop.f32.mrf.mxu0  ;;  %v4125_v41 = vadd.f32 %v1533_v31, %v1205_v62  ;;  %v1753_v62 = vld [vmem:[%s4697_s3 + $0x150] sm:$0xff]  ;;  %v1750_v31 = vld [vmem:[%s4697_s3 + $0x138] sm:$0xff]  ;;  %v2436_v51 = vor.u32 %v2813_v39, %v2435_v5 }
 0x21f   :  { %v1055_v28 = vadd.f32 %v3728_v34, %v1054_v54  ;;  %2015 = vmatpush.msra.mxu2 %v1886_v26  ;;  %v1383_v40 = vpop.f32.mrf.mxu1  ;;  %v1624_v19 = vmax.f32 %v1366_v17, 0.0  ;;  %v1881_v26 = vmul.f32 %v1753_v62, %v1625_v8  ;;  %v1751_v54 = vld [vmem:[%s4697_s3 + $0x140] sm:$0xff]  ;;  %v2437_v8 = vld [vmem:[%s4696_s0 + $0x218] sm:$0xf0]  ;;  %v1620_v62 = vmax.f32 %v3904_v7, 0.0  ;;  %v1745_v5 = vld [vmem:[%s4697_s3 + $0x110] sm:$0xff] }
 0x220   :  { %4715 = vst [vmem:[#allocation17_spill] sm:$0xff] %v4125_v41 }
 0x221   :  { %v4128_v58 = vadd.f32 %v1383_v40, %v1055_v28  ;;  %1093 = vmatmul.bf16.gmra.mxu0 %v2428_v23  ;;  %2016 = vmatpush.msra.mxu2 %v1885_v44  ;;  %v2677_v40 = vld [vmem:[%s4696_s0 + $0x3f8] sm:$0xf0] }
 0x222   :  { %1422 = vmatmul.bf16.gmra.mxu1 %v2432_v59  ;;  %v1752_v59 = vld [vmem:[%s4697_s3 + $0x148] sm:$0xff]  ;;  %v2680_v17 = vor.u32 %v2872_v42, %v2677_v40  ;;  %v1617_v40 = vmax.f32 %v3847_v57, 0.0  ;;  %v1615_v57 = vmax.f32 %v3781_v11, 0.0 }
 0x223   :  { %2017 = vmatpush.msra.mxu2 %v1884_v37  ;;  %v1206_v49 = vpop.f32.mrf.mxu2  ;;  %v1880_v28 = vmul.f32 %v1752_v59, %v1624_v19  ;;  %v1879_v37 = vmul.f32 %v1751_v54, %v1623_v10  ;;  %v1878_v19 = vmul.f32 %v1750_v31, %v1622_v43  ;;  %v1748_v59 = vld [vmem:[%s4697_s3 + $0x128] sm:$0xff]  ;;  %v1619_v10 = vmax.f32 %v3898_v29, 0.0  ;;  %v1746_v29 = vld [vmem:[%s4697_s3 + $0x118] sm:$0xff] }
 0x224   :  { %v1207_v32 = vadd.f32 %v3728_v34, %v1206_v49  ;;  %v1618_v43 = vmax.f32 %v3868_v6, 0.0  ;;  %v1876_v42 = vmul.f32 %v1748_v59, %v1620_v62  ;;  %v1616_v6 = vmax.f32 %v3801_v3, 0.0 }
 0x225   :  { %2018 = vmatpush.msra.mxu2 %v1883_v22  ;;  %v1535_v15 = vpop.f32.mrf.mxu3  ;;  %v1749_v22 = vld [vmem:[%s4697_s3 + $0x130] sm:$0xff]  ;;  %v1662_v3 = vmax.f32 %v3532_v38, 0.0  ;;  %v1661_v59 = vmax.f32 %v3497_v2, 0.0  ;;  %v2443_v38 = vld [vmem:[%s4696_s0 + $0x220] sm:$0xf] }
 0x226   :  { %v1056_v21 = vpop.f32.mrf.mxu0  ;;  %v4145_v20 = vadd.f32 %v1535_v15, %v1207_v32  ;;  %v1747_v15 = vld [vmem:[%s4697_s3 + $0x120] sm:$0xff]  ;;  %v1874_v39 = vmul.f32 %v1746_v29, %v1618_v43  ;;  %v2445_v2 = vld [vmem:[%s4696_s0 + $0x228] sm:$0xf0]  ;;  %v1659_v29 = vmax.f32 %v3430_v4, 0.0 }
 0x227   :  { %v1057_v24 = vadd.f32 %v3728_v34, %v1056_v21  ;;  %2019 = vmatpush.msra.mxu2 %v1882_v16  ;;  %v1385_v23 = vpop.f32.mrf.mxu1  ;;  %v2440_v21 = vor.u32 %v2812_v50, %v2437_v8  ;;  %v1875_v31 = vmul.f32 %v1747_v15, %v1619_v10  ;;  %v1873_v8 = vmul.f32 %v1745_v5, %v1617_v40  ;;  %v1789_v10 = vld [vmem:[%s4697_s3 + $0x270] sm:$0xff]  ;;  %v1788_v43 = vld [vmem:[%s4697_s3 + $0x268] sm:$0xff] }
 0x228   :  { %v1917_v40 = vmul.f32 %v1789_v10, %v1661_v59 }
 0x229   :  { %v4148_v44 = vadd.f32 %v1385_v23, %v1057_v24  ;;  %2020 = vmatpush.msra.mxu2 %v1881_v26  ;;  %v1877_v26 = vmul.f32 %v1749_v22, %v1621_v35 }
 0x22a   :  { %1577 = vmatmul.bf16.gmra.mxu3 %v2680_v17 }
 0x22b   :  { %2021 = vmatpush.msra.mxu2 %v1880_v28  ;;  %v1209_v16 = vpop.f32.mrf.mxu2 }
 0x22c   :  { %v1210_v32 = vadd.f32 %v3728_v34, %v1209_v16 }
 0x22d   :  { %2022 = vmatpush.msra.mxu2 %v1879_v37  ;;  %v1538_v7 = vpop.f32.mrf.mxu3  ;;  %v1744_v37 = vld [vmem:[%s4697_s3 + $0x108] sm:$0xff] }
 0x22e   :  { %v1059_v49 = vpop.f32.mrf.mxu0  ;;  %v4185_v54 = vadd.f32 %v1538_v7, %v1210_v32  ;;  %v1872_v11 = vmul.f32 %v1744_v37, %v1616_v6  ;;  %v2815_v32 = vld [vmem:[%s4696_s0 + $0x224] sm:$0xf0]  ;;  %v1658_v37 = vmax.f32 %v3401_v33, 0.0  ;;  %v1785_v33 = vld [vmem:[%s4697_s3 + $0x250] sm:$0xff] }
 0x22f   :  { %v1060_v24 = vadd.f32 %v3728_v34, %v1059_v49  ;;  %2023 = vmatpush.msra.mxu2 %v1878_v19  ;;  %v1388_v23 = vpop.f32.mrf.mxu1  ;;  %v1790_v49 = vld [vmem:[%s4697_s3 + $0x278] sm:$0xff]  ;;  %v2444_v15 = vor.u32 %v2815_v32, %v2443_v38  ;;  %v1783_v32 = vld [vmem:[%s4697_s3 + $0x240] sm:$0xff] }
 0x230   :  { %v1918_v7 = vmul.f32 %v1790_v49, %v1662_v3 }
 0x231   :  { %v4188_v28 = vadd.f32 %v1388_v23, %v1060_v24  ;;  %1098 = vmatmul.bf16.gmra.mxu0 %v2436_v51  ;;  %2024 = vmatpush.msra.mxu2 %v1877_v26  ;;  %v1743_v51 = vld [vmem:[%s4697_s3 + $0x100] sm:$0xff]  ;;  %v1660_v23 = vmax.f32 %v3469_v27, 0.0 }
 0x232   :  { %1427 = vmatmul.bf16.gmra.mxu1 %v2440_v21  ;;  %v1871_v26 = vmul.f32 %v1743_v51, %v1615_v57  ;;  %v2814_v24 = vld [vmem:[%s4696_s0 + $0x224] sm:$0xf]  ;;  %v1784_v51 = vld [vmem:[%s4697_s3 + $0x248] sm:$0xff] }
 0x233   :  { %2025 = vmatpush.msra.mxu2 %v1876_v42  ;;  %v1211_v17 = vpop.f32.mrf.mxu2  ;;  %v2448_v5 = vor.u32 %v2814_v24, %v2445_v2  ;;  %v1787_v27 = vld [vmem:[%s4697_s3 + $0x260] sm:$0xff] }
 0x234   :  { %v1212_v50 = vadd.f32 %v3728_v34, %v1211_v17 }
 0x235   :  { %2026 = vmatpush.msra.mxu2 %v1875_v31  ;;  %v1540_v19 = vpop.f32.mrf.mxu3 }
 0x236   :  { %v1061_v35 = vpop.f32.mrf.mxu0  ;;  %v4208_v16 = vadd.f32 %v1540_v19, %v1212_v50  ;;  %v1916_v50 = vmul.f32 %v1788_v43, %v1660_v23  ;;  %v1656_v19 = vmax.f32 %v3361_v47, 0.0  ;;  %v2816_v43 = vld [vmem:[%s4696_s0 + $0x234] sm:$0xf] }
 0x237   :  { %v1062_v22 = vadd.f32 %v3728_v34, %v1061_v35  ;;  %2027 = vmatpush.msra.mxu2 %v1874_v39  ;;  %v1390_v62 = vpop.f32.mrf.mxu1 }
 0x238   :  { %v1912_v24 = vmul.f32 %v1784_v51, %v1656_v19 }
 0x239   :  { %v4213_v21 = vadd.f32 %v1390_v62, %v1062_v22  ;;  %2028 = vmatpush.msra.mxu2 %v1873_v8  ;;  %v1786_v8 = vld [vmem:[%s4697_s3 + $0x258] sm:$0xff]  ;;  %v1657_v22 = vmax.f32 %v3371_v0, 0.0  ;;  %v1915_v62 = vmul.f32 %v1787_v27, %v1659_v29 }
 0x23a   :  { %v1914_v3 = vmul.f32 %v1786_v8, %v1658_v37 }
 0x23b   :  { %2029 = vmatpush.msra.mxu2 %v1872_v11  ;;  %v1214_v42 = vpop.f32.mrf.mxu2  ;;  %v1655_v11 = vmax.f32 %v3340_v30, 0.0  ;;  %v1913_v59 = vmul.f32 %v1785_v33, %v1657_v22  ;;  %v4288_v22 = vld [vmem:[%s4695_s2] ss:$0 sm:$0xff] }
 0x23c   :  { %v1215_v6 = vadd.f32 %v3728_v34, %v1214_v42  ;;  %v2453_v42 = vld [vmem:[%s4696_s0 + $0x238] sm:$0xf0] }
 0x23d   :  { %2030 = vmatpush.msra.mxu2 %v1871_v26  ;;  %v1543_v35 = vpop.f32.mrf.mxu3  ;;  %v1911_v30 = vmul.f32 %v1783_v32, %v1655_v11 }
 0x23e   :  { %v1064_v31 = vpop.f32.mrf.mxu0  ;;  %v4242_v57 = vadd.f32 %v1543_v35, %v1215_v6 }
 0x23f   :  { %2055 = vmatpush.msrb.mxu2 %v1918_v7  ;;  %v1065_v39 = vadd.f32 %v3728_v34, %v1064_v31  ;;  %v1393_v17 = vpop.f32.mrf.mxu1  ;;  %v2451_v7 = vld [vmem:[%s4696_s0 + $0x230] sm:$0xf] }
 0x240   :  { %4716 = vst [vmem:[#allocation18_spill] sm:$0xff] %v4242_v57 }
 0x241   :  { %2056 = vmatpush.msrb.mxu2 %v1917_v40  ;;  %v4244_v4 = vadd.f32 %v1393_v17, %v1065_v39  ;;  %1103 = vmatmul.bf16.gmra.mxu0 %v2444_v15  ;;  %v2817_v15 = vld [vmem:[%s4696_s0 + $0x234] sm:$0xf0] }
 0x242   :  { %1432 = vmatmul.bf16.gmra.mxu1 %v2448_v5  ;;  %v2452_v29 = vor.u32 %v2817_v15, %v2451_v7  ;;  %v2456_v5 = vor.u32 %v2816_v43, %v2453_v42 }
 0x243   :  { %2057 = vmatpush.msrb.mxu2 %v1916_v50  ;;  %v1216_v49 = vpop.f32.mrf.mxu2 }
 0x244   :  { %v1217_v38 = vadd.f32 %v3728_v34, %v1216_v49 }
 0x245   :  { %2058 = vmatpush.msrb.mxu2 %v1915_v62  ;;  %v1545_v26 = vpop.f32.mrf.mxu3 }
 0x246   :  { %v1066_v0 = vpop.f32.mrf.mxu0  ;;  %v4263_v2 = vadd.f32 %v1545_v26, %v1217_v38 }
 0x247   :  { %2059 = vmatpush.msrb.mxu2 %v1914_v3  ;;  %v1067_v47 = vadd.f32 %v3728_v34, %v1066_v0  ;;  %v1395_v10 = vpop.f32.mrf.mxu1 }
 0x248   :  { %4717 = vst [vmem:[#allocation19_spill] sm:$0xff] %v4263_v2 }
 0x249   :  { %2060 = vmatpush.msrb.mxu2 %v1913_v59  ;;  %v4265_v23 = vadd.f32 %v1395_v10, %v1067_v47 }
 0x24b   :  { %2061 = vmatpush.msrb.mxu2 %v1912_v24  ;;  %v1219_v40 = vpop.f32.mrf.mxu2 }
 0x24c   :  { %v1220_v6 = vadd.f32 %v3728_v34, %v1219_v40 }
 0x24d   :  { %2062 = vmatpush.msrb.mxu2 %v1911_v30  ;;  %v1548_v17 = vpop.f32.mrf.mxu3 }
 0x24e   :  { %v1069_v31 = vpop.f32.mrf.mxu0  ;;  %v4281_v35 = vadd.f32 %v1548_v17, %v1220_v6 }
 0x24f   :  { %v1070_v27 = vadd.f32 %v3728_v34, %v1069_v31  ;;  %v1398_v39 = vpop.f32.mrf.mxu1 }
 0x250   :  { %4718 = vst [vmem:[#allocation20_spill] sm:$0xff] %v4281_v35  ;;  %v1774_v35 = vld [vmem:[%s4697_s3 + $0x1f8] sm:$0xff] }
 0x251   :  { %v4283_v37 = vadd.f32 %v1398_v39, %v1070_v27  ;;  %1108 = vmatmul.bf16.gmra.mxu0 %v2452_v29 }
 0x252   :  { %1437 = vmatmul.bf16.gmra.mxu1 %v2456_v5 }
 0x253   :  { %v1221_v50 = vpop.f32.mrf.mxu2 }
 0x254   :  { %v1222_v62 = vadd.f32 %v4288_v22, %v1221_v50 }
 0x255   :  { %v1550_v19 = vpop.f32.mrf.mxu3 }
 0x256   :  { %v1071_v8 = vpop.f32.mrf.mxu0  ;;  %v4292_v3 = vadd.f32 %v1550_v19, %v1222_v62 }
 0x257   :  { %v1072_v33 = vadd.f32 %v4288_v22, %v1071_v8  ;;  %v1400_v34 = vpop.f32.mrf.mxu1 }
 0x258   :  { %4719 = vst [vmem:[#allocation21_spill] sm:$0xff] %v4292_v3 }
 0x259   :  { %v4294_v51 = vadd.f32 %v1400_v34, %v1072_v33 }
 0x25b   :  { %v1224_v49 = vpop.f32.mrf.mxu2 }
 0x25c   :  { %v1225_v59 = vadd.f32 %v4288_v22, %v1224_v49 }
 0x25d   :  { %v1553_v32 = vpop.f32.mrf.mxu3 }
 0x25e   :  { %v1074_v11 = vpop.f32.mrf.mxu0  ;;  %v4298_v47 = vadd.f32 %v1553_v32, %v1225_v59 }
 0x25f   :  { %v1075_v0 = vadd.f32 %v4288_v22, %v1074_v11  ;;  %v1403_v38 = vpop.f32.mrf.mxu1 }
 0x261   :  { %v4300_v10 = vadd.f32 %v1403_v38, %v1075_v0 }
 0x263   :  { %v1226_v26 = vpop.f32.mrf.mxu2 }
 0x264   :  { %v1227_v30 = vadd.f32 %v4288_v22, %v1226_v26 }
 0x265   :  { %v1555_v15 = vpop.f32.mrf.mxu3 }
 0x266   :  { %v1076_v24 = vpop.f32.mrf.mxu0  ;;  %v4303_v43 = vadd.f32 %v1555_v15, %v1227_v30 }
 0x267   :  { %v1405_v7 = vpop.f32.mrf.mxu1 }
 0x26b   :  { %v1229_v42 = vpop.f32.mrf.mxu2 }
 0x26c   :  { %v1230_v40 = vadd.f32 %v4288_v22, %v1229_v42 }
 0x26d   :  { %v1558_v5 = vpop.f32.mrf.mxu3 }
 0x26e   :  { %v1079_v29 = vpop.f32.mrf.mxu0  ;;  %v4306_v6 = vadd.f32 %v1558_v5, %v1230_v40 }
 0x26f   :  { %v1408_v31 = vpop.f32.mrf.mxu1 }
 0x273   :  { %v1231_v27 = vpop.f32.mrf.mxu2 }
 0x274   :  { %v1232_v17 = vadd.f32 %v4288_v22, %v1231_v27 }
 0x275   :  { %v1560_v8 = vpop.f32.mrf.mxu3 }
 0x276   :  { %v1081_v39 = vpop.f32.mrf.mxu0  ;;  %v4309_v62 = vadd.f32 %v1560_v8, %v1232_v17 }
 0x277   :  { %v1410_v50 = vpop.f32.mrf.mxu1 }
 0x27b   :  { %v1234_v33 = vpop.f32.mrf.mxu2 }
 0x27c   :  { %v1235_v19 = vadd.f32 %v4288_v22, %v1234_v33 }
 0x27d   :  { %v1563_v11 = vpop.f32.mrf.mxu3 }
 0x27e   :  { %v1084_v34 = vpop.f32.mrf.mxu0  ;;  %v4312_v59 = vadd.f32 %v1563_v11, %v1235_v19  ;;  %v1082_v11 = vadd.f32 %v4288_v22, %v1081_v39 }
 0x27f   :  { %v1413_v49 = vpop.f32.mrf.mxu1  ;;  %v1085_v27 = vadd.f32 %v4288_v22, %v1084_v34  ;;  %v1773_v34 = vld [vmem:[%s4697_s3 + $0x1f0] sm:$0xff] }
 0x280   :  { %v1411_v39 = vadd.f32 %v1410_v50, %v1082_v11 }
 0x283   :  { %v4314_v26 = vpop.f32.mrf.mxu2 }
 0x285   :  { %v4316_v15 = vpop.f32.mrf.mxu3 }
 0x286   :  { %v1086_v0 = vpop.f32.mrf.mxu0 }
 0x287   :  { %v1415_v38 = vpop.f32.mrf.mxu1  ;;  %v1087_v40 = vadd.f32 %v4288_v22, %v1086_v0  ;;  %v1414_v0 = vadd.f32 %v1413_v49, %v1085_v27 }
 0x289   :  { %v1416_v57 = vadd.f32 %v1415_v38, %v1087_v40  ;;  %v1643_v49 = vmax.f32 %v1414_v0, 0.0  ;;  %v1769_v0 = vld [vmem:[%s4697_s3 + $0x1d0] sm:$0xff] }
 0x28b   :  { %v4322_v19 = vpop.f32.mrf.mxu2  ;;  %v1644_v38 = vmax.f32 %v1416_v57, 0.0 }
 0x28e   :  { %v1089_v32 = vpop.f32.mrf.mxu0 }
 0x28f   :  { %v1418_v30 = vpop.f32.mrf.mxu1  ;;  %v1090_v42 = vadd.f32 %v4288_v22, %v1089_v32  ;;  %v1080_v32 = vadd.f32 %v4288_v22, %v1079_v29 }
 0x291   :  { %v1419_v17 = vadd.f32 %v1418_v30, %v1090_v42  ;;  %v4332_v30 = vpop.f32.mrf.mxu3  ;;  %v1077_v42 = vadd.f32 %v4288_v22, %v1076_v24  ;;  %v1409_v29 = vadd.f32 %v1408_v31, %v1080_v32  ;;  %v1770_v31 = vld [vmem:[%s4697_s3 + $0x1d8] sm:$0xff] }
 0x293   :  { %v1645_v3 = vmax.f32 %v1419_v17, 0.0  ;;  %v1406_v57 = vadd.f32 %v1405_v7, %v1077_v42  ;;  %v1641_v11 = vmax.f32 %v1409_v29, 0.0  ;;  %v1768_v42 = vld [vmem:[%s4697_s3 + $0x1c8] sm:$0xff]  ;;  %v1638_v29 = vmax.f32 %v4294_v51, 0.0 }
 0x294   :  { %v1764_v51 = vld [vmem:[%s4697_s3 + $0x1a8] sm:$0xff] }
 0x295   :  { %v1901_v27 = vmul.f32 %v1773_v34, %v1645_v3  ;;  %v4350_v3 = vpop.f32.mrf.mxu2  ;;  %v1640_v34 = vmax.f32 %v1406_v57, 0.0  ;;  %v1636_v57 = vmax.f32 %v4265_v23, 0.0  ;;  %v1634_v23 = vmax.f32 %v4213_v21, 0.0 }
 0x296   :  { %v1091_v5 = vpop.f32.mrf.mxu0  ;;  %v1632_v21 = vmax.f32 %v4148_v44, 0.0  ;;  %v1759_v44 = vld [vmem:[%s4697_s3 + $0x180] sm:$0xff] }
 0x297   :  { %v1092_v8 = vadd.f32 %v4288_v22, %v1091_v5  ;;  %v1420_v33 = vpop.f32.mrf.mxu1  ;;  %v1772_v5 = vld [vmem:[%s4697_s3 + $0x1e8] sm:$0xff] }
 0x298   :  { %v1900_v24 = vmul.f32 %v1772_v5, %v1644_v38  ;;  %v1897_v5 = vmul.f32 %v1769_v0, %v1641_v11 }
 0x299   :  { %v1421_v2 = vadd.f32 %v1420_v33, %v1092_v8  ;;  %v4360_v38 = vpop.f32.mrf.mxu3 }
 0x29b   :  { %v1646_v41 = vmax.f32 %v1421_v2, 0.0  ;;  %v1968_v2 = vld [vmem:[%s4698_s4 + $0x8] sm:$0xff] }
 0x29c   :  { %2011 = vmatmul.f32.vlgmr.msrb.gmra.mxu3 %v1968_v2  ;;  %v1767_v2 = vld [vmem:[%s4697_s3 + $0x1c0] sm:$0xff] }
 0x29d   :  { %v1902_v40 = vmul.f32 %v1774_v35, %v1646_v41  ;;  %v1771_v41 = vld [vmem:[%s4697_s3 + $0x1e0] sm:$0xff]  ;;  %v1642_v35 = vmax.f32 %v1411_v39, 0.0 }
 0x29e   :  { %v1094_v8 = vpop.f32.mrf.mxu0  ;;  %v1899_v32 = vmul.f32 %v1771_v41, %v1643_v49  ;;  %v1896_v49 = vmul.f32 %v1768_v42, %v1640_v34  ;;  %v4376_v41 = vpop.f32.mrf.mxu2  ;;  %v1892_v34 = vmul.f32 %v1764_v51, %v1636_v57  ;;  %v1633_v42 = vmax.f32 %v4188_v28, 0.0  ;;  %v1806_v57 = vld [vmem:[%s4697_s3 + $0x2f8] sm:$0xff] }
 0x29f   :  { %v1095_v17 = vadd.f32 %v4288_v22, %v1094_v8  ;;  %2035 = vmatpush.msra.mxu3 %v1902_v40  ;;  %v1423_v33 = vpop.f32.mrf.mxu1  ;;  %v1898_v7 = vmul.f32 %v1770_v31, %v1642_v35  ;;  %v1639_v40 = vmax.f32 %v4300_v10, 0.0  ;;  %v1765_v10 = vld [vmem:[%s4697_s3 + $0x1b0] sm:$0xff]  ;;  %v1631_v28 = vmax.f32 %v4128_v58, 0.0 }
 0x2a0   :  { %v1677_v51 = vmax.f32 %v3844_v46, 0.0  ;;  %v1805_v58 = vld [vmem:[%s4697_s3 + $0x2f0] sm:$0xff]  ;;  %v1804_v46 = vld [vmem:[%s4697_s3 + $0x2e8] sm:$0xff] }
 0x2a1   :  { %v4345_v50 = vadd.f32 %v1423_v33, %v1095_v17  ;;  %2036 = vmatpush.msra.mxu3 %v1901_v27  ;;  %v1766_v27 = vld [vmem:[%s4697_s3 + $0x1b8] sm:$0xff]  ;;  %v1637_v17 = vmax.f32 %v4283_v37, 0.0  ;;  %v1895_v33 = vmul.f32 %v1767_v2, %v1639_v40  ;;  %v1635_v37 = vmax.f32 %v4244_v4, 0.0  ;;  %v4390_v0 = vpop.f32.mrf.mxu3 }
 0x2a2   :  { %v1894_v35 = vmul.f32 %v1766_v27, %v1638_v29  ;;  %v1762_v4 = vld [vmem:[%s4697_s3 + $0x198] sm:$0xff]  ;;  %v1760_v29 = vld [vmem:[%s4697_s3 + $0x188] sm:$0xff] }
 0x2a3   :  { %2037 = vmatpush.msra.mxu3 %v1900_v24  ;;  %v1893_v31 = vmul.f32 %v1765_v10, %v1637_v17  ;;  %v1890_v2 = vmul.f32 %v1762_v4, %v1634_v23  ;;  %v1678_v10 = vmax.f32 %v3866_v61, 0.0  ;;  %v1676_v61 = vmax.f32 %v3798_v1, 0.0  ;;  %v1970_v23 = vld [vmem:[%s4698_s4 + $0x18] sm:$0xff]  ;;  %v1803_v1 = vld [vmem:[%s4697_s3 + $0x2e0] sm:$0xff] }
 0x2a5   :  { %2038 = vmatpush.msra.mxu3 %v1899_v32  ;;  %v1763_v32 = vld [vmem:[%s4697_s3 + $0x1a0] sm:$0xff] }
 0x2a6   :  { %v4358_v39 = vpop.f32.mrf.mxu0  ;;  %v1891_v40 = vmul.f32 %v1763_v32, %v1635_v37  ;;  %v4409_v27 = vpop.f32.mrf.mxu2  ;;  %v1934_v32 = vmul.f32 %v1806_v57, %v1678_v10  ;;  %v1671_v57 = vmax.f32 %v3688_v60, 0.0 }
 0x2a7   :  { %2039 = vmatpush.msra.mxu3 %v1898_v7  ;;  %v4363_v8 = vpop.f32.mrf.mxu1  ;;  %v1969_v7 = vld [vmem:[%s4698_s4 + $0x10] sm:$0xff] }
 0x2a8   :  { %2031 = vmatmul.f32.vlgmr.msra.gmra.mxu2 %v1969_v7  ;;  %v1933_v7 = vmul.f32 %v1805_v58, %v1677_v51 }
 0x2a9   :  { %2040 = vmatpush.msra.mxu3 %v1897_v5  ;;  %v1761_v5 = vld [vmem:[%s4697_s3 + $0x190] sm:$0xff]  ;;  %v4422_v37 = vpop.f32.mrf.mxu3 }
 0x2aa   :  { %v1889_v17 = vmul.f32 %v1761_v5, %v1633_v42  ;;  %v1932_v5 = vmul.f32 %v1804_v46, %v1676_v61  ;;  %v1798_v61 = vld [vmem:[%s4697_s3 + $0x2b8] sm:$0xff]  ;;  %v1797_v46 = vld [vmem:[%s4697_s3 + $0x2b0] sm:$0xff] }
 0x2ab   :  { %2041 = vmatpush.msra.mxu3 %v1896_v49 }
 0x2ad   :  { %2042 = vmatpush.msra.mxu3 %v1895_v33 }
 0x2ae   :  { %v4382_v24 = vpop.f32.mrf.mxu0 }
 0x2af   :  { %2043 = vmatpush.msra.mxu3 %v1894_v35  ;;  %v4385_v11 = vpop.f32.mrf.mxu1  ;;  %v1888_v35 = vmul.f32 %v1760_v29, %v1632_v21  ;;  %v1249_v21 = vpop.f32.mrf.mxu2 }
 0x2b1   :  { %2044 = vmatpush.msra.mxu3 %v1893_v31  ;;  %v1887_v31 = vmul.f32 %v1759_v44, %v1631_v28  ;;  %v1801_v28 = vld [vmem:[%s4697_s3 + $0x2d0] sm:$0xff]  ;;  %v1800_v44 = vld [vmem:[%s4697_s3 + $0x2c8] sm:$0xff] }
 0x2b3   :  { %2045 = vmatpush.msra.mxu3 %v1892_v34  ;;  %v1675_v34 = vmax.f32 %v3778_v25, 0.0  ;;  %v1802_v25 = vld [vmem:[%s4697_s3 + $0x2d8] sm:$0xff] }
 0x2b5   :  { %2046 = vmatpush.msra.mxu3 %v1891_v40  ;;  %v1674_v40 = vmax.f32 %v3732_v56, 0.0  ;;  %v1931_v29 = vmul.f32 %v1803_v1, %v1675_v34  ;;  %v1578_v56 = vpop.f32.mrf.mxu3  ;;  %v1668_v34 = vmax.f32 %v3641_v12, 0.0  ;;  %v1250_v12 = vadd.f32 %v4288_v22, %v1249_v21  ;;  %v1793_v21 = vld [vmem:[%s4697_s3 + $0x290] sm:$0xff] }
 0x2b6   :  { %v4407_v49 = vpop.f32.mrf.mxu0 }
 0x2b7   :  { %2047 = vmatpush.msra.mxu3 %v1890_v2  ;;  %v4412_v33 = vpop.f32.mrf.mxu1  ;;  %v1673_v2 = vmax.f32 %v3718_v48, 0.0  ;;  %v1930_v10 = vmul.f32 %v1802_v25, %v1674_v40  ;;  %v1799_v48 = vld [vmem:[%s4697_s3 + $0x2c0] sm:$0xff]  ;;  %v1251_v60 = vpop.f32.mrf.mxu2  ;;  %v1667_v40 = vmax.f32 %v3616_v52, 0.0  ;;  %v1794_v52 = vld [vmem:[%s4697_s3 + $0x298] sm:$0xff] }
 0x2b8   :  { %v1252_v1 = vadd.f32 %v4288_v22, %v1251_v60 }
 0x2b9   :  { %2048 = vmatpush.msra.mxu3 %v1889_v17  ;;  %v1672_v17 = vmax.f32 %v3691_v14, 0.0 }
 0x2bb   :  { %2049 = vmatpush.msra.mxu3 %v1888_v35  ;;  %v1929_v35 = vmul.f32 %v1801_v28, %v1673_v2  ;;  %v1928_v14 = vmul.f32 %v1800_v44, %v1672_v17  ;;  %v1795_v2 = vld [vmem:[%s4697_s3 + $0x2a0] sm:$0xff]  ;;  %v1666_v28 = vmax.f32 %v3604_v36, 0.0  ;;  %v1665_v44 = vmax.f32 %v3580_v18, 0.0 }
 0x2bd   :  { %2050 = vmatpush.msra.mxu3 %v1887_v31  ;;  %v1670_v31 = vmax.f32 %v3679_v55, 0.0  ;;  %v1796_v55 = vld [vmem:[%s4697_s3 + $0x2a8] sm:$0xff]  ;;  %v1580_v25 = vpop.f32.mrf.mxu3  ;;  %v1922_v18 = vmul.f32 %v1794_v52, %v1666_v28  ;;  %v1921_v60 = vmul.f32 %v1793_v21, %v1665_v44 }
 0x2be   :  { %v4435_v4 = vpop.f32.mrf.mxu0  ;;  %2051 = vmatmul.f32.vlgmr.msra.gmra.mxu3 %v1970_v23  ;;  %v1927_v23 = vmul.f32 %v1799_v48, %v1671_v57  ;;  %v1924_v17 = vmul.f32 %v1796_v55, %v1668_v34  ;;  %v1923_v57 = vmul.f32 %v1795_v2, %v1667_v40  ;;  %v1579_v48 = vadd.f32 %v1578_v56, %v1250_v12  ;;  %v1792_v56 = vld [vmem:[%s4697_s3 + $0x288] sm:$0xff] }
 0x2bf   :  { %2075 = vmatpush.msrb.mxu3 %v1934_v32  ;;  %v4440_v42 = vpop.f32.mrf.mxu1  ;;  %v1669_v32 = vmax.f32 %v3654_v53, 0.0  ;;  %v1240_v40 = vadd.f32 %v4288_v22, %v4322_v19  ;;  %v1100_v19 = vadd.f32 %v4288_v22, %v4382_v24 }
 0x2c0   :  { %v1709_v34 = vmax.f32 %v1579_v48, 0.0 }
 0x2c1   :  { %2076 = vmatpush.msrb.mxu3 %v1933_v7  ;;  %v1926_v7 = vmul.f32 %v1798_v61, %v1670_v31  ;;  %v1925_v53 = vmul.f32 %v1797_v46, %v1669_v32  ;;  %v1663_v31 = vmax.f32 %v3544_v45, 0.0  ;;  %v1245_v61 = vadd.f32 %v4288_v22, %v4376_v41  ;;  %v1838_v46 = vld [vmem:[%s4697_s3 + $0x3f8] sm:$0xff] }
 0x2c2   :  { %v1242_v45 = vadd.f32 %v4288_v22, %v4350_v3  ;;  %v1569_v44 = vadd.f32 %v4332_v30, %v1240_v40 }
 0x2c3   :  { %2077 = vmatpush.msrb.mxu3 %v1932_v5  ;;  %v1574_v3 = vadd.f32 %v4390_v0, %v1245_v61  ;;  %v1429_v61 = vadd.f32 %v4385_v11, %v1100_v19  ;;  %v1833_v11 = vld [vmem:[%s4697_s3 + $0x3d0] sm:$0xff]  ;;  %v1775_v19 = vld [vmem:[%s4697_s3 + $0x200] sm:$0xff] }
 0x2c4   :  { %v1571_v0 = vadd.f32 %v4360_v38, %v1242_v45  ;;  %v1836_v38 = vld [vmem:[%s4697_s3 + $0x3e8] sm:$0xff] }
 0x2c5   :  { %2078 = vmatpush.msrb.mxu3 %v1931_v29  ;;  %v1707_v24 = vmax.f32 %v1574_v3, 0.0 }
 0x2c6   :  { %v1106_v51 = vpop.f32.mrf.mxu0  ;;  %v1706_v48 = vmax.f32 %v1571_v0, 0.0 }
 0x2c7   :  { %2079 = vmatpush.msrb.mxu3 %v1930_v10  ;;  %v1435_v58 = vpop.f32.mrf.mxu1  ;;  %v1581_v10 = vadd.f32 %v1580_v25, %v1252_v1  ;;  %v1107_v32 = vadd.f32 %v4288_v22, %v1106_v51  ;;  %v1105_v51 = vadd.f32 %v4288_v22, %v4435_v4  ;;  %v1102_v4 = vadd.f32 %v4288_v22, %v4407_v49 }
 0x2c9   :  { %2080 = vmatpush.msrb.mxu3 %v1929_v35  ;;  %v1247_v35 = vadd.f32 %v4288_v22, %v4409_v27  ;;  %v1791_v27 = vld [vmem:[%s4697_s3 + $0x280] sm:$0xff]  ;;  %v1436_v25 = vadd.f32 %v1435_v58, %v1107_v32 }
 0x2ca   :  { %v1919_v1 = vmul.f32 %v1791_v27, %v1663_v31  ;;  %v1835_v31 = vld [vmem:[%s4697_s3 + $0x3e0] sm:$0xff]  ;;  %v1705_v27 = vmax.f32 %v1569_v44, 0.0 }
 0x2cb   :  { %2081 = vmatpush.msrb.mxu3 %v1928_v14  ;;  %v1664_v14 = vmax.f32 %v3568_v63, 0.0  ;;  %v1576_v63 = vadd.f32 %v4422_v37, %v1247_v35  ;;  %v1837_v37 = vld [vmem:[%s4697_s3 + $0x3f0] sm:$0xff]  ;;  %v1431_v35 = vadd.f32 %v4412_v33, %v1102_v4  ;;  %v1652_v21 = vmax.f32 %v1436_v25, 0.0  ;;  %v1779_v32 = vld [vmem:[%s4697_s3 + $0x220] sm:$0xff] }
 0x2cc   :  { %v1965_v49 = vmul.f32 %v1837_v37, %v1709_v34  ;;  %v1961_v40 = vmul.f32 %v1833_v11, %v1705_v27  ;;  %v1831_v37 = vld [vmem:[%s4697_s3 + $0x3c0] sm:$0xff]  ;;  %v1647_v4 = vmax.f32 %v4345_v50, 0.0  ;;  %v1701_v50 = vmax.f32 %v4306_v6, 0.0  ;;  %v1818_v11 = vld [vmem:[%s4697_s3 + $0x358] sm:$0xff] }
 0x2cd   :  { %2082 = vmatpush.msrb.mxu3 %v1927_v23  ;;  %v1710_v23 = vmax.f32 %v1581_v10, 0.0  ;;  %v1708_v28 = vmax.f32 %v1576_v63, 0.0  ;;  %v1434_v10 = vadd.f32 %v4440_v42, %v1105_v51  ;;  %v1097_v42 = vadd.f32 %v4288_v22, %v4358_v39  ;;  %v1778_v63 = vld [vmem:[%s4697_s3 + $0x218] sm:$0xff] }
 0x2ce   :  { %v1109_v5 = vpop.f32.mrf.mxu0 }
 0x2cf   :  { %2083 = vmatpush.msrb.mxu3 %v1926_v7  ;;  %v1438_v29 = vpop.f32.mrf.mxu1  ;;  %v1110_v36 = vadd.f32 %v4288_v22, %v1109_v5  ;;  %v1920_v5 = vmul.f32 %v1792_v56, %v1664_v14  ;;  %v1966_v2 = vmul.f32 %v1838_v46, %v1710_v23  ;;  %v1780_v14 = vld [vmem:[%s4697_s3 + $0x228] sm:$0xff]  ;;  %v1651_v39 = vmax.f32 %v1434_v10, 0.0  ;;  %v1821_v10 = vld [vmem:[%s4697_s3 + $0x370] sm:$0xff] }
 0x2d0   :  { %v1426_v23 = vadd.f32 %v4363_v8, %v1097_v42  ;;  %v1650_v56 = vmax.f32 %v1431_v35, 0.0  ;;  %v1908_v45 = vmul.f32 %v1780_v14, %v1652_v21  ;;  %v1649_v46 = vmax.f32 %v1429_v61, 0.0  ;;  %v1832_v8 = vld [vmem:[%s4697_s3 + $0x3c8] sm:$0xff]  ;;  %v1827_v61 = vld [vmem:[%s4697_s3 + $0x3a0] sm:$0xff] }
 0x2d1   :  { %2084 = vmatpush.msrb.mxu3 %v1925_v53  ;;  %v1439_v7 = vadd.f32 %v1438_v29, %v1110_v36  ;;  %v1237_v29 = vadd.f32 %v4288_v22, %v4314_v26  ;;  %v1972_v26 = vld [vmem:[%s4698_s4 + $0x28] sm:$0xff]  ;;  %v1907_v34 = vmul.f32 %v1779_v32, %v1651_v39  ;;  %v1699_v42 = vmax.f32 %v4298_v47, 0.0  ;;  %v1819_v47 = vld [vmem:[%s4697_s3 + $0x360] sm:$0xff]  ;;  %v4725_v39 = vld [vmem:[#allocation21_spill] sm:$0xff] }
 0x2d2   :  { %v1906_v3 = vmul.f32 %v1778_v63, %v1650_v56  ;;  %v4722_v21 = vld [vmem:[#allocation11_spill] sm:$0xff]  ;;  %v4727_v56 = vld [vmem:[#allocation20_spill] sm:$0xff] }
 0x2d3   :  { %2085 = vmatpush.msrb.mxu3 %v1924_v17  ;;  %v1782_v17 = vld [vmem:[%s4697_s3 + $0x238] sm:$0xff]  ;;  %v1653_v58 = vmax.f32 %v1439_v7, 0.0  ;;  %v1566_v30 = vadd.f32 %v4316_v15, %v1237_v29  ;;  %v1777_v7 = vld [vmem:[%s4697_s3 + $0x210] sm:$0xff] }
 0x2d4   :  { %v1834_v15 = vld [vmem:[%s4697_s3 + $0x3d8] sm:$0xff]  ;;  %v4728_v63 = vld [vmem:[#allocation12_spill] sm:$0xff] }
 0x2d5   :  { %2086 = vmatpush.msrb.mxu3 %v1923_v57  ;;  %v1781_v57 = vld [vmem:[%s4697_s3 + $0x230] sm:$0xff]  ;;  %v1962_v51 = vmul.f32 %v1834_v15, %v1706_v48  ;;  %v1830_v29 = vld [vmem:[%s4697_s3 + $0x3b8] sm:$0xff] }
 0x2d6   :  { %v1111_v41 = vpop.f32.mrf.mxu0  ;;  %v1909_v33 = vmul.f32 %v1781_v57, %v1653_v58  ;;  %v1903_v58 = vmul.f32 %v1775_v19, %v1647_v4  ;;  %v1820_v57 = vld [vmem:[%s4697_s3 + $0x368] sm:$0xff]  ;;  %v4724_v48 = vld [vmem:[#allocation17_spill] sm:$0xff]  ;;  %v1815_v19 = vld [vmem:[%s4697_s3 + $0x340] sm:$0xff] }
 0x2d7   :  { %2087 = vmatpush.msrb.mxu3 %v1922_v18  ;;  %v1112_v55 = vadd.f32 %v4288_v22, %v1111_v41  ;;  %v1440_v53 = vpop.f32.mrf.mxu1  ;;  %v1964_v18 = vmul.f32 %v1836_v38, %v1708_v28  ;;  %v1704_v41 = vmax.f32 %v1566_v30, 0.0  ;;  %v1828_v38 = vld [vmem:[%s4697_s3 + $0x3a8] sm:$0xff] }
 0x2d9   :  { %2088 = vmatpush.msrb.mxu3 %v1921_v60  ;;  %v1441_v12 = vadd.f32 %v1440_v53, %v1112_v55  ;;  %v1963_v60 = vmul.f32 %v1835_v31, %v1707_v24  ;;  %v1703_v55 = vmax.f32 %v4312_v59, 0.0  ;;  %v1776_v53 = vld [vmem:[%s4697_s3 + $0x208] sm:$0xff]  ;;  %v1960_v25 = vmul.f32 %v1832_v8, %v1704_v41 }
 0x2da   :  { %v1202_v59 = vadd.f32 %v4288_v22, %v4077_v13  ;;  %v1200_v13 = vadd.f32 %v4288_v22, %v4071_v9  ;;  %v4721_v9 = vld [vmem:[#allocation16_spill] sm:$0xff]  ;;  %v1691_v31 = vmax.f32 %v4724_v48, 0.0  ;;  %v4729_v8 = vld [vmem:[#allocation19_spill] sm:$0xff] }
 0x2db   :  { %2089 = vmatpush.msrb.mxu3 %v1920_v5  ;;  %v1654_v52 = vmax.f32 %v1441_v12, 0.0  ;;  %v1702_v5 = vmax.f32 %v4309_v62, 0.0  ;;  %v1694_v12 = vmax.f32 %v4208_v16, 0.0  ;;  %v1822_v62 = vld [vmem:[%s4697_s3 + $0x378] sm:$0xff]  ;;  %v1959_v0 = vmul.f32 %v1831_v37, %v1703_v55  ;;  %v4737_v48 = vld [vmem:[#allocation4_spill] sm:$0xff] }
 0x2dc   :  { %v1693_v16 = vmax.f32 %v4185_v54, 0.0  ;;  %v1531_v44 = vadd.f32 %v4721_v9, %v1202_v59  ;;  %v1692_v54 = vmax.f32 %v4145_v20, 0.0  ;;  %v1195_v20 = vadd.f32 %v4288_v22, %v4722_v21  ;;  %v1823_v59 = vld [vmem:[%s4697_s3 + $0x380] sm:$0xff]  ;;  %v1812_v9 = vld [vmem:[%s4697_s3 + $0x328] sm:$0xff]  ;;  %v4736_v21 = vld [vmem:[#allocation5_spill] sm:$0xff] }
 0x2dd   :  { %2090 = vmatpush.msrb.mxu3 %v1919_v1  ;;  %v1910_v36 = vmul.f32 %v1782_v17, %v1654_v52  ;;  %v1648_v1 = vmax.f32 %v1426_v23, 0.0  ;;  %v1829_v17 = vld [vmem:[%s4697_s3 + $0x3b0] sm:$0xff]  ;;  %v1958_v6 = vmul.f32 %v1830_v29, %v1702_v5  ;;  %v1950_v24 = vmul.f32 %v1822_v62, %v1694_v12  ;;  %v1826_v23 = vld [vmem:[%s4697_s3 + $0x398] sm:$0xff] }
 0x2de   :  { %2091 = vmatmul.f32.vlgmr.msrb.gmra.mxu3 %v1972_v26  ;;  %v4720_v52 = vld [vmem:[#allocation13_spill] sm:$0xff]  ;;  %v1957_v35 = vmul.f32 %v1829_v17, %v1701_v50  ;;  %v1949_v14 = vmul.f32 %v1821_v10, %v1693_v16  ;;  %v1690_v15 = vmax.f32 %v1531_v44, 0.0  ;;  %v1948_v32 = vmul.f32 %v1820_v57, %v1692_v54  ;;  %v4731_v62 = vld [vmem:[#allocation10_spill] sm:$0xff]  ;;  %v4734_v44 = vld [vmem:[#allocation7_spill] sm:$0xff] }
 0x2df   :  { %2115 = vmatpush.msra.mxu3 %v1966_v2  ;;  %2063 = vmatpush.msrb.mxu2 %v1910_v36  ;;  %v1905_v2 = vmul.f32 %v1777_v7, %v1649_v46  ;;  %v1904_v28 = vmul.f32 %v1776_v53, %v1648_v1  ;;  %v1197_v26 = vadd.f32 %v4288_v22, %v4720_v52  ;;  %v4723_v36 = vld [vmem:[#allocation15_spill] sm:$0xff]  ;;  %v4726_v22 = vld [vmem:[#allocation14_spill] sm:$0xff]  ;;  %v1696_v7 = vmax.f32 %v4729_v8, 0.0  ;;  %v1817_v1 = vld [vmem:[%s4697_s3 + $0x350] sm:$0xff] }
 0x2e0   :  { %v1529_v30 = vadd.f32 %v4723_v36, %v1200_v13  ;;  %v1524_v41 = vadd.f32 %v4728_v63, %v1195_v20  ;;  %v1946_v37 = vmul.f32 %v1818_v11, %v1690_v15  ;;  %v4730_v53 = vld [vmem:[#allocation18_spill] sm:$0xff]  ;;  %v1686_v50 = vmax.f32 %v4731_v62, 0.0  ;;  %v4732_v17 = vld [vmem:[#allocation9_spill] sm:$0xff] }
 0x2e1   :  { %2116 = vmatpush.msra.mxu3 %v1965_v49  ;;  %2064 = vmatpush.msrb.mxu2 %v1909_v33  ;;  %v1700_v49 = vmax.f32 %v4303_v43, 0.0  ;;  %v1971_v43 = vld [vmem:[%s4698_s4 + $0x20] sm:$0xff]  ;;  %v1526_v27 = vadd.f32 %v4726_v22, %v1197_v26  ;;  %v1695_v5 = vmax.f32 %v4730_v53, 0.0  ;;  %v1814_v13 = vld [vmem:[%s4697_s3 + $0x338] sm:$0xff]  ;;  %v1685_v10 = vmax.f32 %v4732_v17, 0.0  ;;  %v1973_v15 = vld [vmem:[%s4698_s4 + $0x30] sm:$0xff] }
 0x2e2   :  { %v1689_v46 = vmax.f32 %v1529_v30, 0.0  ;;  %v1974_v16 = vld [vmem:[%s4698_s4 + $0x38] sm:$0xff]  ;;  %v1942_v26 = vmul.f32 %v1814_v13, %v1686_v50  ;;  %v1683_v54 = vmax.f32 %v4734_v44, 0.0  ;;  %v1681_v20 = vmax.f32 %v4736_v21, 0.0  ;;  %v1809_v30 = vld [vmem:[%s4697_s3 + $0x310] sm:$0xff] }
 0x2e3   :  { %2117 = vmatpush.msra.mxu3 %v1964_v18  ;;  %2065 = vmatpush.msrb.mxu2 %v1908_v45  ;;  %v1698_v18 = vmax.f32 %v4725_v39, 0.0  ;;  %v1956_v33 = vmul.f32 %v1828_v38, %v1700_v49  ;;  %v1955_v45 = vmul.f32 %v1827_v61, %v1699_v42  ;;  %v1811_v38 = vld [vmem:[%s4697_s3 + $0x320] sm:$0xff]  ;;  %v1808_v61 = vld [vmem:[%s4697_s3 + $0x308] sm:$0xff] }
 0x2e4   :  { %v1945_v12 = vmul.f32 %v1817_v1, %v1689_v46  ;;  %v1939_v36 = vmul.f32 %v1811_v38, %v1683_v54 }
 0x2e5   :  { %2118 = vmatpush.msra.mxu3 %v1963_v60  ;;  %2066 = vmatpush.msrb.mxu2 %v1907_v34  ;;  %v1697_v60 = vmax.f32 %v4727_v56, 0.0  ;;  %v1825_v34 = vld [vmem:[%s4697_s3 + $0x390] sm:$0xff]  ;;  %v1954_v55 = vmul.f32 %v1826_v23, %v1698_v18  ;;  %v1937_v18 = vmul.f32 %v1809_v30, %v1681_v20  ;;  %v11_v56 = vstv %s4699_s5 }
 0x2e6   :  { %12 = vst [vmem:[#allocation2] sm:$0x1] %v11_v56 }
 0x2e7   :  { %2119 = vmatpush.msra.mxu3 %v1962_v51  ;;  %2067 = vmatpush.msrb.mxu2 %v1906_v3  ;;  %v1947_v51 = vmul.f32 %v1819_v47, %v1691_v31  ;;  %v1824_v3 = vld [vmem:[%s4697_s3 + $0x388] sm:$0xff]  ;;  %v1953_v4 = vmul.f32 %v1825_v34, %v1697_v60  ;;  %v1680_v31 = vmax.f32 %v4737_v48, 0.0 }
 0x2e8   :  { %v1952_v29 = vmul.f32 %v1824_v3, %v1696_v7  ;;  %v4738_v47 = vld [vmem:[#allocation3_spill] sm:$0xff] }
 0x2e9   :  { %2120 = vmatpush.msra.mxu3 %v1961_v40  ;;  %2068 = vmatpush.msrb.mxu2 %v1905_v2  ;;  %v1688_v40 = vmax.f32 %v1526_v27, 0.0  ;;  %v1687_v2 = vmax.f32 %v1524_v41, 0.0  ;;  %v1679_v39 = vmax.f32 %v4738_v47, 0.0  ;;  %v1936_v22 = vmul.f32 %v1808_v61, %v1680_v31 }
 0x2eb   :  { %2121 = vmatpush.msra.mxu3 %v1960_v25  ;;  %2069 = vmatpush.msrb.mxu2 %v1904_v28  ;;  %v1816_v25 = vld [vmem:[%s4697_s3 + $0x348] sm:$0xff]  ;;  %v1951_v28 = vmul.f32 %v1823_v59, %v1695_v5  ;;  %v1943_v49 = vmul.f32 %v1815_v19, %v1687_v2 }
 0x2ed   :  { %2122 = vmatpush.msra.mxu3 %v1959_v0  ;;  %2070 = vmatpush.msrb.mxu2 %v1903_v58  ;;  %v1944_v0 = vmul.f32 %v1816_v25, %v1688_v40  ;;  %v4733_v58 = vld [vmem:[#allocation8_spill] sm:$0xff] }
 0x2ee   :  { %2071 = vmatmul.f32.vlgmr.msrb.gmra.mxu2 %v1971_v43  ;;  %v1684_v52 = vmax.f32 %v4733_v58, 0.0  ;;  %v4735_v43 = vld [vmem:[#allocation6_spill] sm:$0xff] }
 0x2ef   :  { %2123 = vmatpush.msra.mxu3 %v1958_v6  ;;  %2095 = vmatpush.msra.mxu2 %v1950_v24  ;;  %v1813_v6 = vld [vmem:[%s4697_s3 + $0x330] sm:$0xff]  ;;  %v1682_v57 = vmax.f32 %v4735_v43, 0.0 }
 0x2f0   :  { %v1941_v24 = vmul.f32 %v1813_v6, %v1685_v10  ;;  %v1940_v42 = vmul.f32 %v1812_v9, %v1684_v52 }
 0x2f1   :  { %2124 = vmatpush.msra.mxu3 %v1957_v35  ;;  %2096 = vmatpush.msra.mxu2 %v1949_v14  ;;  %v1810_v35 = vld [vmem:[%s4697_s3 + $0x318] sm:$0xff] }
 0x2f2   :  { %v1938_v14 = vmul.f32 %v1810_v35, %v1682_v57 }
 0x2f3   :  { %2125 = vmatpush.msra.mxu3 %v1956_v33  ;;  %2097 = vmatpush.msra.mxu2 %v1948_v32  ;;  %v1807_v33 = vld [vmem:[%s4697_s3 + $0x300] sm:$0xff]  ;;  %v1992_v32 = vpop.f32.mrf.mxu2 }
 0x2f4   :  { %v1935_v27 = vmul.f32 %v1807_v33, %v1679_v39 }
 0x2f5   :  { %2126 = vmatpush.msra.mxu3 %v1955_v45  ;;  %2098 = vmatpush.msra.mxu2 %v1947_v51 }
 0x2f7   :  { %2127 = vmatpush.msra.mxu3 %v1954_v55  ;;  %2099 = vmatpush.msra.mxu2 %v1946_v37  ;;  %v2907_v37 = vld [vmem:[#allocation2] ss:$0 sm:$0xff] }
 0x2f9   :  { %2128 = vmatpush.msra.mxu3 %v1953_v4  ;;  %2100 = vmatpush.msra.mxu2 %v1945_v12 }
 0x2fb   :  { %2129 = vmatpush.msra.mxu3 %v1952_v29  ;;  %2101 = vmatpush.msra.mxu2 %v1944_v0 }
 0x2fd   :  { %2130 = vmatpush.msra.mxu3 %v1951_v28  ;;  %2102 = vmatpush.msra.mxu2 %v1943_v49 }
 0x2fe   :  { %2131 = vmatmul.f32.vlgmr.msra.gmra.mxu3 %v1974_v16 }
 0x2ff   :  { %2103 = vmatpush.msra.mxu2 %v1942_v26 }
 0x301   :  { %2104 = vmatpush.msra.mxu2 %v1941_v24 }
 0x303   :  { %2105 = vmatpush.msra.mxu2 %v1940_v42 }
 0x305   :  { %2106 = vmatpush.msra.mxu2 %v1939_v36 }
 0x307   :  { %2107 = vmatpush.msra.mxu2 %v1938_v14 }
 0x309   :  { %2108 = vmatpush.msra.mxu2 %v1937_v18 }
 0x30b   :  { %2109 = vmatpush.msra.mxu2 %v1936_v22 }
 0x30d   :  { %2110 = vmatpush.msra.mxu2 %v1935_v27 }
 0x30e   :  { %2111 = vmatmul.f32.vlgmr.msra.gmra.mxu2 %v1973_v15 }
 0x31f   :  { %v2012_v23 = vpop.f32.mrf.mxu3 }
 0x320   :  { %v2013_v11 = vadd.f32 %v2012_v23, %v1992_v32 }
 0x32b   :  { %v2032_v60 = vpop.f32.mrf.mxu2 }
 0x32c   :  { %v2033_v63 = vadd.f32 %v2032_v60, %v2013_v11 }
 0x341   :  { %v2052_v45 = vpop.f32.mrf.mxu3 }
 0x342   :  { %v2053_v51 = vadd.f32 %v2052_v45, %v2033_v63 }
 0x361   :  { %v2092_v46 = vpop.f32.mrf.mxu3 }
 0x371   :  { %v2072_v41 = vpop.f32.mrf.mxu2 }
 0x372   :  { %v2073_v34 = vadd.f32 %v2072_v41, %v2053_v51 }
 0x374   :  { %v2093_v8 = vadd.f32 %v2092_v46, %v2073_v34 }
 0x381   :  { %v2132_v55 = vpop.f32.mrf.mxu3 }
 0x391   :  { %v2112_v7 = vpop.f32.mrf.mxu2 }
 0x392   :  { %v2113_v1 = vadd.f32 %v2112_v7, %v2093_v8 }
 0x394   :  { %v2133_v40 = vadd.f32 %v2132_v55, %v2113_v1 }
 0x396   :  { %v2136_v3 = vsel %vm2135_vm0, %v2133_v40, 0.0 }
 0x397   :  { %2137 = vadd.xlane.f32.xlu0 %v2136_v3 }
 0x40a   :  { %v2138_v53 = vpop.xlane.xlu0 %2137 }
 0x40b   :  { %v2143_v5 = vadd.f32 %v2907_v37, %v2138_v53 }
 0x40d   :  { %v2745_v4 = vmul.f32 -1.442695, %v2143_v5 }
 0x40f   :  { %2908 = vpow2.f32 %v2745_v4 }
 0x415   :  { %v2909_v25 = vpop.eup %2908 }
 0x416   :  { %v2147_v2 = vadd.f32 1.0, %v2909_v25 }
 0x418   :  { %2910 = vrcp.f32 %v2147_v2  ;;  %v2159_v19 = vand.u32 2147483648, %v2147_v2  ;;  %v2157_v50 = vand.u32 2147483647, %v2147_v2  ;;  %vm2153_vm2 = vweird.f32 %v2147_v2 }
 0x41a   :  { %v2160_v28 = vor.u32 1.1754944e-38, %v2159_v19  ;;  %vm2158_vm5 = vcmp.eq.f32.partialorder %v2157_v50, 8.507059e+37 }
 0x41e   :  { %v2911_v59 = vpop.eup %2910 }
 0x41f   :  { %v2149_v12 = vmul.f32 %v2911_v59, %v2147_v2  ;;  %vm2154_vm1 = vweird.f32 %v2911_v59 }
 0x420   :  { %vm2155_vm3 = vmor %vm2153_vm2, %vm2154_vm1 }
 0x421   :  { %v2150_v29 = vsub.f32 1.0, %v2149_v12 }
 0x423   :  { %v2151_v62 = vmul.f32 %v2911_v59, %v2150_v29 }
 0x425   :  { %v2152_v0 = vadd.f32 %v2911_v59, %v2151_v62 }
 0x427   :  { %v2156_v13 = vsel %vm2155_vm3, %v2911_v59, %v2152_v0 }
 0x428   :  { %v2161_v16 = vsel %vm2158_vm5, %v2160_v28, %v2156_v13 }
 0x429   :  { %2164 = vst.msk [vmem:[%s4700_s6] sm:$0xff] %vm2163_vm4, %v2161_v16 }

</bundles_post_ra>
